<compile_context>
chip_gen: v5e
topology: v5e:2x2
jax: 0.10.0
libtpu: 0.0.40
codegen_flags: <defaults>
</compile_context>

<pallas_src>
import math
import functools

import jax
import jax.numpy as jnp
from jax import lax
from jax.experimental import pallas as pl
from jax.experimental.pallas import tpu as pltpu


def _mha_kernel(q_ref, k_ref, v_ref,
                wq_ref, bq_ref, wk_ref, bk_ref, wv_ref, bv_ref,
                wo_ref, bo_ref,
                o_ref,
                qproj_ref, m_ref, l_ref, acc_ref,
                *, n_heads, d_qk, d_v, approx_recip):
    """Grid = (batch, q_tile, kv_tile); kv_tile is the (last, 'arbitrary') reduction axis."""
    ki = pl.program_id(2)
    nk = pl.num_programs(2)
    cdt = qproj_ref.dtype  # MXU compute dtype (bf16 on the fast path, f32 otherwise)

    @pl.when(ki == 0)
    def _init():
        # Fused, lane-dense Q projection for this query tile; 1/sqrt(d_model) is
        # already folded into wq/bq. Stays resident in scratch across the KV loop.
        q = q_ref[0]                                                    # (TQ, d_model)
        qp = jnp.dot(q, wq_ref[...], preferred_element_type=jnp.float32) + bq_ref[...]
        qproj_ref[...] = qp.astype(cdt)                                 # (TQ, H*d_qk)
        m_ref[...] = jnp.full_like(m_ref, -jnp.inf)
        l_ref[...] = jnp.zeros_like(l_ref)
        acc_ref[...] = jnp.zeros_like(acc_ref)

    # Fused K/V projections for the current KV tile (lane-dense N = H*d_qk / H*d_v).
    k = k_ref[0]                                                        # (TK, d_model)
    v = v_ref[0]
    k_all = (jnp.dot(k, wk_ref[...], preferred_element_type=jnp.float32)
             + bk_ref[...]).astype(cdt)                                 # (TK, H*d_qk)
    v_all = (jnp.dot(v, wv_ref[...], preferred_element_type=jnp.float32)
             + bv_ref[...]).astype(cdt)                                 # (TK, H*d_v)

    # Static head loop; every head's intermediates are consumed before the next head.
    for h in range(n_heads):
        qh = qproj_ref[:, h * d_qk:(h + 1) * d_qk]                      # (TQ, d_qk)
        kh = k_all[:, h * d_qk:(h + 1) * d_qk]                          # (TK, d_qk)
        vh = v_all[:, h * d_v:(h + 1) * d_v]                            # (TK, d_v)

        # scores = Q @ K^T without an explicit (XLU) transpose of K.
        s = lax.dot_general(qh, kh, (((1,), (1,)), ((), ())),
                            preferred_element_type=jnp.float32)         # (TQ, TK)

        # Online (flash) softmax update, stats kept in f32.
        m_prev = m_ref[h]                                               # (TQ, 1)
        m_new = jnp.maximum(m_prev, jnp.max(s, axis=-1, keepdims=True))
        alpha = jnp.exp(m_prev - m_new)
        p = jnp.exp(s - m_new)                                          # (TQ, TK) f32
        l_ref[h] = alpha * l_ref[h] + jnp.sum(p, axis=-1, keepdims=True)
        m_ref[h] = m_new

        pv = jnp.dot(p.astype(cdt), vh, preferred_element_type=jnp.float32)
        sl = slice(h * d_v, (h + 1) * d_v)
        acc_ref[:, sl] = alpha * acc_ref[:, sl] + pv                    # head slab, no concat

    @pl.when(ki == nk - 1)
    def _finalize():
        # Normalize each head's slab, then do the output projection from the
        # lane-dense (TQ, H*d_v) slab (the "concat" is free).
        for h in range(n_heads):
            if approx_recip:
                inv_l = pl.reciprocal(l_ref[h], approx=True)
            else:
                inv_l = 1.0 / l_ref[h]
            sl = slice(h * d_v, (h + 1) * d_v)
            acc_ref[:, sl] = acc_ref[:, sl] * inv_l
        concat = acc_ref[...].astype(cdt)                               # (TQ, H*d_v)
        out = jnp.dot(concat, wo_ref[...], preferred_element_type=jnp.float32) + bo_ref[...]
        o_ref[0] = out.astype(o_ref.dtype)


def _padded_bytes(shape, dtype):
    """Rough VMEM footprint of a buffer, padded to (8, 128) tiles on the last 2 dims."""
    itemsize = jnp.dtype(dtype).itemsize
    shape = tuple(int(d) for d in shape)
    if len(shape) == 1:
        shape = (1,) + shape
    lead = 1
    for d in shape[:-2]:
        lead *= d
    sub = -(-shape[-2] // 8) * 8
    lane = -(-shape[-1] // 128) * 128
    return lead * sub * lane * itemsize


def _fuse_params(params, d_model, use_bf16):
    """Fuse per-head weights head-major along the output dim; fold the 1/sqrt(d_model) scale."""
    scale = 1.0 / math.sqrt(float(d_model))
    wdt = jnp.bfloat16 if use_bf16 else jnp.float32

    def fuse_w(w):  # (H, d_model, n) -> (d_model, H*n), head h occupies cols [h*n, (h+1)*n)
        return jnp.transpose(w, (1, 0, 2)).reshape(w.shape[1], -1)

    wq = (fuse_w(params["wq"]) * scale).astype(wdt)
    bq = (params["bq"].reshape(1, -1) * scale).astype(jnp.float32)
    wk = fuse_w(params["wk"]).astype(wdt)
    bk = params["bk"].reshape(1, -1).astype(jnp.float32)
    wv = fuse_w(params["wv"]).astype(wdt)
    bv = params["bv"].reshape(1, -1).astype(jnp.float32)
    wo = params["wo"].astype(wdt)                     # (H*d_v, d_model)
    bo = params["bo"].reshape(1, -1).astype(jnp.float32)
    return wq, bq, wk, bk, wv, bv, wo, bo


def multi_headed_attention(q, k, v, params, *, use_bf16=True, tq=256, tk=512):
    """q, k, v: (B, S, d_model). Returns (B, S, d_model) in q.dtype."""
    B, S, d_model = q.shape
    H, _, d_qk = params["wq"].shape
    d_v = params["wv"].shape[-1]

    tq = min(tq, S)
    tk = min(tk, S)
    assert S % tq == 0 and S % tk == 0, "sequence length must divide the chosen tiles"

    cdt = jnp.bfloat16 if use_bf16 else jnp.float32
    out_dtype = q.dtype

    wq, bq, wk, bk, wv, bv, wo, bo = _fuse_params(params, d_model, use_bf16)
    qc, kc, vc = (x.astype(cdt) for x in (q, k, v))

    kernel = functools.partial(_mha_kernel, n_heads=H, d_qk=d_qk, d_v=d_v,
                               approx_recip=use_bf16)

    grid = (B, S // tq, S // tk)
    q_spec = pl.BlockSpec((1, tq, d_model), lambda b, qi, ki: (b, qi, 0))
    kv_spec = pl.BlockSpec((1, tk, d_model), lambda b, qi, ki: (b, ki, 0))
    o_spec = pl.BlockSpec((1, tq, d_model), lambda b, qi, ki: (b, qi, 0))
    const = lambda shape: pl.BlockSpec(shape, lambda b, qi, ki: (0, 0))

    # Explicit scoped-VMEM budget derived from the chosen tiles (with headroom).
    # TODO(synk): weight blocks use constant index_maps (DMA'd once) but are still
    # budgeted double-buffered here; single-buffering them would save more VMEM.
    vmem_est = (
        2 * _padded_bytes((tq, d_model), cdt)               # q tile, double-buffered
        + 2 * 2 * _padded_bytes((tk, d_model), cdt)         # k, v tiles
        + 2 * _padded_bytes((tq, d_model), out_dtype)       # out tile
        + sum(2 * _padded_bytes(a.shape, a.dtype)
              for a in (wq, bq, wk, bk, wv, bv, wo, bo))    # fused weights / biases
        + _padded_bytes((tq, H * d_qk), cdt)                # q-projection scratch
        + 2 * H * _padded_bytes((tq, 1), jnp.float32)       # running max / sum
        + _padded_bytes((tq, H * d_v), jnp.float32)         # head-output slab
    )
    vmem_limit = int(max(32 << 20, min(100 << 20, vmem_est + (4 << 20))))

    return pl.pallas_call(
        kernel,
        out_shape=jax.ShapeDtypeStruct((B, S, d_model), out_dtype),
        grid_spec=pltpu.PrefetchScalarGridSpec(
            num_scalar_prefetch=0,
            grid=grid,
            in_specs=[
                q_spec, kv_spec, kv_spec,
                const(wq.shape), const(bq.shape),
                const(wk.shape), const(bk.shape),
                const(wv.shape), const(bv.shape),
                const(wo.shape), const(bo.shape),
            ],
            out_specs=o_spec,
            scratch_shapes=[
                pltpu.VMEM((tq, H * d_qk), cdt),            # fused Q projection
                pltpu.VMEM((H, tq, 1), jnp.float32),        # running max (per head)
                pltpu.VMEM((H, tq, 1), jnp.float32),        # running sum (per head)
                pltpu.VMEM((tq, H * d_v), jnp.float32),     # head-output ("concat") slab
            ]),
        compiler_params=pltpu.CompilerParams(
            dimension_semantics=("parallel", "parallel", "arbitrary"),
            vmem_limit_bytes=vmem_limit),
    )(qc, kc, vc, wq, bq, wk, bk, wv, bv, wo, bo)


def _init_params(key, d_model, d_qk, d_v, n_heads):
    """Deterministic init mimicking nn.Linear default (uniform +/- 1/sqrt(fan_in))."""
    keys = jax.random.split(key, 8)

    def u(k, shape, fan_in):
        bound = 1.0 / math.sqrt(fan_in)
        return jax.random.uniform(k, shape, jnp.float32, -bound, bound)

    return {
        # stored pre-transposed relative to torch: (fan_in, fan_out)
        "wq": u(keys[0], (n_heads, d_model, d_qk), d_model),
        "bq": u(keys[1], (n_heads, d_qk), d_model),
        "wk": u(keys[2], (n_heads, d_model, d_qk), d_model),
        "bk": u(keys[3], (n_heads, d_qk), d_model),
        "wv": u(keys[4], (n_heads, d_model, d_v), d_model),
        "bv": u(keys[5], (n_heads, d_v), d_model),
        "wo": u(keys[6], (n_heads * d_v, d_model), n_heads * d_v),
        "bo": u(keys[7], (d_model,), n_heads * d_v),
    }


def _reference(q, k, v, params):
    """Pure-JAX reference mirroring the PyTorch forward exactly."""
    d_model = q.shape[-1]
    H = params["wq"].shape[0]
    outs = []
    for h in range(H):
        Q = q @ params["wq"][h] + params["bq"][h]
        K = k @ params["wk"][h] + params["bk"][h]
        V = v @ params["wv"][h] + params["bv"][h]
        scores = jnp.einsum("bqd,bkd->bqk", Q, K) / math.sqrt(d_model)
        p = jax.nn.softmax(scores, axis=-1)
        outs.append(jnp.einsum("bqk,bkd->bqd", p, V))
    concat = jnp.concatenate(outs, axis=-1)
    return concat @ params["wo"] + params["bo"]


if __name__ == "__main__":
    # small shapes consistent with the module's config-driven dims
    B, S = 2, 8
    d_model, d_qk, d_v, n_heads = 32, 16, 16, 4

    key = jax.random.PRNGKey(0)
    kq_, kk_, kv_, kp_ = jax.random.split(key, 4)
    q = jax.random.normal(kq_, (B, S, d_model), jnp.float32)
    k = jax.random.normal(kk_, (B, S, d_model), jnp.float32)
    v = jax.random.normal(kv_, (B, S, d_model), jnp.float32)
    params = _init_params(kp_, d_model, d_qk, d_v, n_heads)

    ref = _reference(q, k, v, params)

    # Exact path (f32 MXU inputs): tight check against the PyTorch-equivalent reference.
    out_f32 = jax.block_until_ready(
        multi_headed_attention(q, k, v, params, use_bf16=False))
    assert out_f32.shape == (B, S, d_model)
    assert jnp.allclose(out_f32, ref, atol=1e-4, rtol=1e-4), "f32 path mismatch vs reference"

    # Fast path (bf16 MXU inputs, f32 accumulation): looser, bf16-appropriate check.
    out_bf16 = jax.block_until_ready(
        multi_headed_attention(q, k, v, params, use_bf16=True))
    assert out_bf16.shape == (B, S, d_model)
    assert jnp.allclose(out_bf16, ref, atol=1e-1, rtol=1e-1), "bf16 path mismatch vs reference"

    # TODO(synk): masked=True variant (causal -inf mask) not exercised; default
    # MultiHeadedAttention(masked=False) path is what is implemented here.
    print("KERNEL_OK")
</pallas_src>

<mosaic_0001>
module attributes {stable_mosaic.version = 11 : i64} {
  func.func @_mha_kernel(%arg0: i32, %arg1: i32, %arg2: i32, %arg3: memref<1x8x32xf32, #tpu.memory_space<vmem>>, %arg4: memref<1x8x32xf32, #tpu.memory_space<vmem>>, %arg5: memref<1x8x32xf32, #tpu.memory_space<vmem>>, %arg6: memref<32x64xf32, #tpu.memory_space<vmem>>, %arg7: memref<1x64xf32, #tpu.memory_space<vmem>>, %arg8: memref<32x64xf32, #tpu.memory_space<vmem>>, %arg9: memref<1x64xf32, #tpu.memory_space<vmem>>, %arg10: memref<32x64xf32, #tpu.memory_space<vmem>>, %arg11: memref<1x64xf32, #tpu.memory_space<vmem>>, %arg12: memref<64x32xf32, #tpu.memory_space<vmem>>, %arg13: memref<1x32xf32, #tpu.memory_space<vmem>>, %arg14: memref<1x8x32xf32, #tpu.memory_space<vmem>>, %arg15: memref<8x64xf32, #tpu.memory_space<vmem>>, %arg16: memref<4x8x1xf32, #tpu.memory_space<vmem>>, %arg17: memref<4x8x1xf32, #tpu.memory_space<vmem>>, %arg18: memref<8x64xf32, #tpu.memory_space<vmem>>) attributes {dimension_semantics = [#tpu.dimension_semantics<parallel>, #tpu.dimension_semantics<parallel>, #tpu.dimension_semantics<arbitrary>], iteration_bounds = array<i64: 2, 1, 1>, scalar_prefetch = 0 : i64, scratch_operands = 4 : i64, tpu.core_type = #tpu.core_type<tc>, window_params = [{transform_indices = @transform_0, window_bounds = array<i64: 1, 8, 32>}, {transform_indices = @transform_1, window_bounds = array<i64: 1, 8, 32>}, {transform_indices = @transform_2, window_bounds = array<i64: 1, 8, 32>}, {pipeline_mode = #tpu.pipeline_mode<synchronous>, transform_indices = @transform_3, window_bounds = array<i64: 32, 64>}, {pipeline_mode = #tpu.pipeline_mode<synchronous>, transform_indices = @transform_4, window_bounds = array<i64: 1, 64>}, {pipeline_mode = #tpu.pipeline_mode<synchronous>, transform_indices = @transform_5, window_bounds = array<i64: 32, 64>}, {pipeline_mode = #tpu.pipeline_mode<synchronous>, transform_indices = @transform_6, window_bounds = array<i64: 1, 64>}, {pipeline_mode = #tpu.pipeline_mode<synchronous>, transform_indices = @transform_7, window_bounds = array<i64: 32, 64>}, {pipeline_mode = #tpu.pipeline_mode<synchronous>, transform_indices = @transform_8, window_bounds = array<i64: 1, 64>}, {pipeline_mode = #tpu.pipeline_mode<synchronous>, transform_indices = @transform_9, window_bounds = array<i64: 64, 32>}, {pipeline_mode = #tpu.pipeline_mode<synchronous>, transform_indices = @transform_10, window_bounds = array<i64: 1, 32>}, {transform_indices = @transform_11, window_bounds = array<i64: 1, 8, 32>}]} {
    %c0_i32 = arith.constant 0 : i32
    %0 = arith.cmpi eq, %arg2, %c0_i32 : i32
    %1 = arith.extui %0 : i1 to i32
    %c0_i32_0 = arith.constant 0 : i32
    %2 = arith.cmpi ne, %1, %c0_i32_0 : i32
    scf.if %2 {
      %c0_99 = arith.constant 0 : index
      %c0_100 = arith.constant 0 : index
      %c0_101 = arith.constant 0 : index
      %148 = vector.load %arg3[%c0_99, %c0_100, %c0_101] : memref<1x8x32xf32, #tpu.memory_space<vmem>>, vector<1x8x32xf32>
      %149 = vector.shape_cast %148 : vector<1x8x32xf32> to vector<8x32xf32>
      %c0_102 = arith.constant 0 : index
      %c0_103 = arith.constant 0 : index
      %150 = vector.load %arg6[%c0_102, %c0_103] : memref<32x64xf32, #tpu.memory_space<vmem>>, vector<32x64xf32>
      %cst_104 = arith.constant dense<0.000000e+00> : vector<8x64xf32>
      %151 = tpu.matmul %149, %150, %cst_104 {dimension_numbers = #tpu.dot_dimension_numbers<[1], [0], [0], [1], [0, 0, 1, 1], [], []>} : vector<8x32xf32>, vector<32x64xf32>, vector<8x64xf32> -> vector<8x64xf32>
      %c0_105 = arith.constant 0 : index
      %c0_106 = arith.constant 0 : index
      %152 = vector.load %arg7[%c0_105, %c0_106] : memref<1x64xf32, #tpu.memory_space<vmem>>, vector<1x64xf32>
      %153 = vector.broadcast %152 : vector<1x64xf32> to vector<8x64xf32>
      %154 = arith.addf %151, %153 : vector<8x64xf32>
      %c0_107 = arith.constant 0 : index
      %c0_108 = arith.constant 0 : index
      %155 = vector.load %arg15[%c0_107, %c0_108] : memref<8x64xf32, #tpu.memory_space<vmem>>, vector<8x64xf32>
      tpu.vector_store %arg15[%c0_107, %c0_108], %154 {strides = array<i32>} : memref<8x64xf32, #tpu.memory_space<vmem>>, vector<8x64xf32>,
      %cst_109 = arith.constant 0xFF800000 : f32
      %156 = vector.broadcast %cst_109 : f32 to vector<4x8x1xf32>
      %c0_110 = arith.constant 0 : index
      %c0_111 = arith.constant 0 : index
      %c0_112 = arith.constant 0 : index
      %157 = vector.load %arg16[%c0_110, %c0_111, %c0_112] : memref<4x8x1xf32, #tpu.memory_space<vmem>>, vector<4x8x1xf32>
      tpu.vector_store %arg16[%c0_110, %c0_111, %c0_112], %156 {strides = array<i32>} : memref<4x8x1xf32, #tpu.memory_space<vmem>>, vector<4x8x1xf32>,
      %cst_113 = arith.constant 0.000000e+00 : f32
      %158 = vector.broadcast %cst_113 : f32 to vector<4x8x1xf32>
      %c0_114 = arith.constant 0 : index
      %c0_115 = arith.constant 0 : index
      %c0_116 = arith.constant 0 : index
      %159 = vector.load %arg17[%c0_114, %c0_115, %c0_116] : memref<4x8x1xf32, #tpu.memory_space<vmem>>, vector<4x8x1xf32>
      tpu.vector_store %arg17[%c0_114, %c0_115, %c0_116], %158 {strides = array<i32>} : memref<4x8x1xf32, #tpu.memory_space<vmem>>, vector<4x8x1xf32>,
      %cst_117 = arith.constant 0.000000e+00 : f32
      %160 = vector.broadcast %cst_117 : f32 to vector<8x64xf32>
      %c0_118 = arith.constant 0 : index
      %c0_119 = arith.constant 0 : index
      %161 = vector.load %arg18[%c0_118, %c0_119] : memref<8x64xf32, #tpu.memory_space<vmem>>, vector<8x64xf32>
      tpu.vector_store %arg18[%c0_118, %c0_119], %160 {strides = array<i32>} : memref<8x64xf32, #tpu.memory_space<vmem>>, vector<8x64xf32>,
    } else {
    }
    %c0 = arith.constant 0 : index
    %c0_1 = arith.constant 0 : index
    %c0_2 = arith.constant 0 : index
    %3 = vector.load %arg4[%c0, %c0_1, %c0_2] : memref<1x8x32xf32, #tpu.memory_space<vmem>>, vector<1x8x32xf32>
    %4 = vector.shape_cast %3 : vector<1x8x32xf32> to vector<8x32xf32>
    %c0_3 = arith.constant 0 : index
    %c0_4 = arith.constant 0 : index
    %c0_5 = arith.constant 0 : index
    %5 = vector.load %arg5[%c0_3, %c0_4, %c0_5] : memref<1x8x32xf32, #tpu.memory_space<vmem>>, vector<1x8x32xf32>
    %6 = vector.shape_cast %5 : vector<1x8x32xf32> to vector<8x32xf32>
    %c0_6 = arith.constant 0 : index
    %c0_7 = arith.constant 0 : index
    %7 = vector.load %arg8[%c0_6, %c0_7] : memref<32x64xf32, #tpu.memory_space<vmem>>, vector<32x64xf32>
    %cst = arith.constant dense<0.000000e+00> : vector<8x64xf32>
    %8 = tpu.matmul %4, %7, %cst {dimension_numbers = #tpu.dot_dimension_numbers<[1], [0], [0], [1], [0, 0, 1, 1], [], []>} : vector<8x32xf32>, vector<32x64xf32>, vector<8x64xf32> -> vector<8x64xf32>
    %c0_8 = arith.constant 0 : index
    %c0_9 = arith.constant 0 : index
    %9 = vector.load %arg9[%c0_8, %c0_9] : memref<1x64xf32, #tpu.memory_space<vmem>>, vector<1x64xf32>
    %10 = vector.broadcast %9 : vector<1x64xf32> to vector<8x64xf32>
    %11 = arith.addf %8, %10 : vector<8x64xf32>
    %c0_10 = arith.constant 0 : index
    %c0_11 = arith.constant 0 : index
    %12 = vector.load %arg10[%c0_10, %c0_11] : memref<32x64xf32, #tpu.memory_space<vmem>>, vector<32x64xf32>
    %cst_12 = arith.constant dense<0.000000e+00> : vector<8x64xf32>
    %13 = tpu.matmul %6, %12, %cst_12 {dimension_numbers = #tpu.dot_dimension_numbers<[1], [0], [0], [1], [0, 0, 1, 1], [], []>} : vector<8x32xf32>, vector<32x64xf32>, vector<8x64xf32> -> vector<8x64xf32>
    %c0_13 = arith.constant 0 : index
    %c0_14 = arith.constant 0 : index
    %14 = vector.load %arg11[%c0_13, %c0_14] : memref<1x64xf32, #tpu.memory_space<vmem>>, vector<1x64xf32>
    %15 = vector.broadcast %14 : vector<1x64xf32> to vector<8x64xf32>
    %16 = arith.addf %13, %15 : vector<8x64xf32>
    %c0_15 = arith.constant 0 : index
    %c0_16 = arith.constant 0 : index
    %17 = vector.load %arg15[%c0_15, %c0_16] : memref<8x64xf32, #tpu.memory_space<vmem>>, vector<8x16xf32>
    %18 = vector.extract_strided_slice %11 {offsets = [0, 0], sizes = [8, 16], strides = [1, 1]} : vector<8x64xf32> to vector<8x16xf32>
    %19 = vector.extract_strided_slice %16 {offsets = [0, 0], sizes = [8, 16], strides = [1, 1]} : vector<8x64xf32> to vector<8x16xf32>
    %cst_17 = arith.constant dense<0.000000e+00> : vector<8x8xf32>
    %20 = tpu.matmul %17, %18, %cst_17 {dimension_numbers = #tpu.dot_dimension_numbers<[1], [1], [0], [0], [0, 0, 1, 0], [], []>} : vector<8x16xf32>, vector<8x16xf32>, vector<8x8xf32> -> vector<8x8xf32>
    %c0_18 = arith.constant 0 : index
    %c0_19 = arith.constant 0 : index
    %c0_20 = arith.constant 0 : index
    %21 = vector.load %arg16[%c0_18, %c0_19, %c0_20] : memref<4x8x1xf32, #tpu.memory_space<vmem>>, vector<1x8x1xf32>
    %22 = vector.shape_cast %21 : vector<1x8x1xf32> to vector<8x1xf32>
    %cst_21 = arith.constant dense<0xFF800000> : vector<8xf32>
    %23 = vector.multi_reduction <maximumf>, %20, %cst_21 [1] : vector<8x8xf32> to vector<8xf32>
    %24 = vector.shape_cast %23 : vector<8xf32> to vector<8x1xf32>
    %25 = arith.maximumf %22, %24 : vector<8x1xf32>
    %26 = arith.subf %22, %25 : vector<8x1xf32>
    %27 = math.exp %26 : vector<8x1xf32>
    %28 = vector.broadcast %25 : vector<8x1xf32> to vector<8x8xf32>
    %29 = arith.subf %20, %28 : vector<8x8xf32>
    %30 = math.exp %29 : vector<8x8xf32>
    %c0_22 = arith.constant 0 : index
    %c0_23 = arith.constant 0 : index
    %c0_24 = arith.constant 0 : index
    %31 = vector.load %arg17[%c0_22, %c0_23, %c0_24] : memref<4x8x1xf32, #tpu.memory_space<vmem>>, vector<1x8x1xf32>
    %32 = vector.shape_cast %31 : vector<1x8x1xf32> to vector<8x1xf32>
    %33 = arith.mulf %27, %32 : vector<8x1xf32>
    %cst_25 = arith.constant dense<0.000000e+00> : vector<8xf32>
    %34 = vector.multi_reduction <add>, %30, %cst_25 [1] : vector<8x8xf32> to vector<8xf32>
    %35 = vector.shape_cast %34 : vector<8xf32> to vector<8x1xf32>
    %36 = arith.addf %33, %35 : vector<8x1xf32>
    %c0_26 = arith.constant 0 : index
    %c0_27 = arith.constant 0 : index
    %c0_28 = arith.constant 0 : index
    %37 = vector.load %arg17[%c0_26, %c0_27, %c0_28] : memref<4x8x1xf32, #tpu.memory_space<vmem>>, vector<1x8x1xf32>
    %38 = vector.shape_cast %37 : vector<1x8x1xf32> to vector<8x1xf32>
    %39 = vector.shape_cast %36 : vector<8x1xf32> to vector<1x8x1xf32>
    tpu.vector_store %arg17[%c0_26, %c0_27, %c0_28], %39 {strides = array<i32>} : memref<4x8x1xf32, #tpu.memory_space<vmem>>, vector<1x8x1xf32>,
    %c0_29 = arith.constant 0 : index
    %c0_30 = arith.constant 0 : index
    %c0_31 = arith.constant 0 : index
    %40 = vector.load %arg16[%c0_29, %c0_30, %c0_31] : memref<4x8x1xf32, #tpu.memory_space<vmem>>, vector<1x8x1xf32>
    %41 = vector.shape_cast %40 : vector<1x8x1xf32> to vector<8x1xf32>
    %42 = vector.shape_cast %25 : vector<8x1xf32> to vector<1x8x1xf32>
    tpu.vector_store %arg16[%c0_29, %c0_30, %c0_31], %42 {strides = array<i32>} : memref<4x8x1xf32, #tpu.memory_space<vmem>>, vector<1x8x1xf32>,
    %cst_32 = arith.constant dense<0.000000e+00> : vector<8x16xf32>
    %43 = tpu.matmul %30, %19, %cst_32 {dimension_numbers = #tpu.dot_dimension_numbers<[1], [0], [0], [1], [0, 0, 1, 1], [], []>} : vector<8x8xf32>, vector<8x16xf32>, vector<8x16xf32> -> vector<8x16xf32>
    %c0_33 = arith.constant 0 : index
    %c0_34 = arith.constant 0 : index
    %44 = vector.load %arg18[%c0_33, %c0_34] : memref<8x64xf32, #tpu.memory_space<vmem>>, vector<8x16xf32>
    %45 = vector.broadcast %27 : vector<8x1xf32> to vector<8x16xf32>
    %46 = arith.mulf %45, %44 : vector<8x16xf32>
    %47 = arith.addf %46, %43 : vector<8x16xf32>
    %c0_35 = arith.constant 0 : index
    %c0_36 = arith.constant 0 : index
    %48 = vector.load %arg18[%c0_35, %c0_36] : memref<8x64xf32, #tpu.memory_space<vmem>>, vector<8x16xf32>
    tpu.vector_store %arg18[%c0_35, %c0_36], %47 {strides = array<i32>} : memref<8x64xf32, #tpu.memory_space<vmem>>, vector<8x16xf32>,
    %c0_37 = arith.constant 0 : index
    %c16 = arith.constant 16 : index
    %49 = vector.load %arg15[%c0_37, %c16] : memref<8x64xf32, #tpu.memory_space<vmem>>, vector<8x16xf32>
    %50 = vector.extract_strided_slice %11 {offsets = [0, 16], sizes = [8, 16], strides = [1, 1]} : vector<8x64xf32> to vector<8x16xf32>
    %51 = vector.extract_strided_slice %16 {offsets = [0, 16], sizes = [8, 16], strides = [1, 1]} : vector<8x64xf32> to vector<8x16xf32>
    %cst_38 = arith.constant dense<0.000000e+00> : vector<8x8xf32>
    %52 = tpu.matmul %49, %50, %cst_38 {dimension_numbers = #tpu.dot_dimension_numbers<[1], [1], [0], [0], [0, 0, 1, 0], [], []>} : vector<8x16xf32>, vector<8x16xf32>, vector<8x8xf32> -> vector<8x8xf32>
    %c1 = arith.constant 1 : index
    %c0_39 = arith.constant 0 : index
    %c0_40 = arith.constant 0 : index
    %53 = vector.load %arg16[%c1, %c0_39, %c0_40] : memref<4x8x1xf32, #tpu.memory_space<vmem>>, vector<1x8x1xf32>
    %54 = vector.shape_cast %53 : vector<1x8x1xf32> to vector<8x1xf32>
    %cst_41 = arith.constant dense<0xFF800000> : vector<8xf32>
    %55 = vector.multi_reduction <maximumf>, %52, %cst_41 [1] : vector<8x8xf32> to vector<8xf32>
    %56 = vector.shape_cast %55 : vector<8xf32> to vector<8x1xf32>
    %57 = arith.maximumf %54, %56 : vector<8x1xf32>
    %58 = arith.subf %54, %57 : vector<8x1xf32>
    %59 = math.exp %58 : vector<8x1xf32>
    %60 = vector.broadcast %57 : vector<8x1xf32> to vector<8x8xf32>
    %61 = arith.subf %52, %60 : vector<8x8xf32>
    %62 = math.exp %61 : vector<8x8xf32>
    %c1_42 = arith.constant 1 : index
    %c0_43 = arith.constant 0 : index
    %c0_44 = arith.constant 0 : index
    %63 = vector.load %arg17[%c1_42, %c0_43, %c0_44] : memref<4x8x1xf32, #tpu.memory_space<vmem>>, vector<1x8x1xf32>
    %64 = vector.shape_cast %63 : vector<1x8x1xf32> to vector<8x1xf32>
    %65 = arith.mulf %59, %64 : vector<8x1xf32>
    %cst_45 = arith.constant dense<0.000000e+00> : vector<8xf32>
    %66 = vector.multi_reduction <add>, %62, %cst_45 [1] : vector<8x8xf32> to vector<8xf32>
    %67 = vector.shape_cast %66 : vector<8xf32> to vector<8x1xf32>
    %68 = arith.addf %65, %67 : vector<8x1xf32>
    %c1_46 = arith.constant 1 : index
    %c0_47 = arith.constant 0 : index
    %c0_48 = arith.constant 0 : index
    %69 = vector.load %arg17[%c1_46, %c0_47, %c0_48] : memref<4x8x1xf32, #tpu.memory_space<vmem>>, vector<1x8x1xf32>
    %70 = vector.shape_cast %69 : vector<1x8x1xf32> to vector<8x1xf32>
    %71 = vector.shape_cast %68 : vector<8x1xf32> to vector<1x8x1xf32>
    tpu.vector_store %arg17[%c1_46, %c0_47, %c0_48], %71 {strides = array<i32>} : memref<4x8x1xf32, #tpu.memory_space<vmem>>, vector<1x8x1xf32>,
    %c1_49 = arith.constant 1 : index
    %c0_50 = arith.constant 0 : index
    %c0_51 = arith.constant 0 : index
    %72 = vector.load %arg16[%c1_49, %c0_50, %c0_51] : memref<4x8x1xf32, #tpu.memory_space<vmem>>, vector<1x8x1xf32>
    %73 = vector.shape_cast %72 : vector<1x8x1xf32> to vector<8x1xf32>
    %74 = vector.shape_cast %57 : vector<8x1xf32> to vector<1x8x1xf32>
    tpu.vector_store %arg16[%c1_49, %c0_50, %c0_51], %74 {strides = array<i32>} : memref<4x8x1xf32, #tpu.memory_space<vmem>>, vector<1x8x1xf32>,
    %cst_52 = arith.constant dense<0.000000e+00> : vector<8x16xf32>
    %75 = tpu.matmul %62, %51, %cst_52 {dimension_numbers = #tpu.dot_dimension_numbers<[1], [0], [0], [1], [0, 0, 1, 1], [], []>} : vector<8x8xf32>, vector<8x16xf32>, vector<8x16xf32> -> vector<8x16xf32>
    %c0_53 = arith.constant 0 : index
    %c16_54 = arith.constant 16 : index
    %76 = vector.load %arg18[%c0_53, %c16_54] : memref<8x64xf32, #tpu.memory_space<vmem>>, vector<8x16xf32>
    %77 = vector.broadcast %59 : vector<8x1xf32> to vector<8x16xf32>
    %78 = arith.mulf %77, %76 : vector<8x16xf32>
    %79 = arith.addf %78, %75 : vector<8x16xf32>
    %c0_55 = arith.constant 0 : index
    %c16_56 = arith.constant 16 : index
    %80 = vector.load %arg18[%c0_55, %c16_56] : memref<8x64xf32, #tpu.memory_space<vmem>>, vector<8x16xf32>
    tpu.vector_store %arg18[%c0_55, %c16_56], %79 {strides = array<i32>} : memref<8x64xf32, #tpu.memory_space<vmem>>, vector<8x16xf32>,
    %c0_57 = arith.constant 0 : index
    %c32 = arith.constant 32 : index
    %81 = vector.load %arg15[%c0_57, %c32] : memref<8x64xf32, #tpu.memory_space<vmem>>, vector<8x16xf32>
    %82 = vector.extract_strided_slice %11 {offsets = [0, 32], sizes = [8, 16], strides = [1, 1]} : vector<8x64xf32> to vector<8x16xf32>
    %83 = vector.extract_strided_slice %16 {offsets = [0, 32], sizes = [8, 16], strides = [1, 1]} : vector<8x64xf32> to vector<8x16xf32>
    %cst_58 = arith.constant dense<0.000000e+00> : vector<8x8xf32>
    %84 = tpu.matmul %81, %82, %cst_58 {dimension_numbers = #tpu.dot_dimension_numbers<[1], [1], [0], [0], [0, 0, 1, 0], [], []>} : vector<8x16xf32>, vector<8x16xf32>, vector<8x8xf32> -> vector<8x8xf32>
    %c2 = arith.constant 2 : index
    %c0_59 = arith.constant 0 : index
    %c0_60 = arith.constant 0 : index
    %85 = vector.load %arg16[%c2, %c0_59, %c0_60] : memref<4x8x1xf32, #tpu.memory_space<vmem>>, vector<1x8x1xf32>
    %86 = vector.shape_cast %85 : vector<1x8x1xf32> to vector<8x1xf32>
    %cst_61 = arith.constant dense<0xFF800000> : vector<8xf32>
    %87 = vector.multi_reduction <maximumf>, %84, %cst_61 [1] : vector<8x8xf32> to vector<8xf32>
    %88 = vector.shape_cast %87 : vector<8xf32> to vector<8x1xf32>
    %89 = arith.maximumf %86, %88 : vector<8x1xf32>
    %90 = arith.subf %86, %89 : vector<8x1xf32>
    %91 = math.exp %90 : vector<8x1xf32>
    %92 = vector.broadcast %89 : vector<8x1xf32> to vector<8x8xf32>
    %93 = arith.subf %84, %92 : vector<8x8xf32>
    %94 = math.exp %93 : vector<8x8xf32>
    %c2_62 = arith.constant 2 : index
    %c0_63 = arith.constant 0 : index
    %c0_64 = arith.constant 0 : index
    %95 = vector.load %arg17[%c2_62, %c0_63, %c0_64] : memref<4x8x1xf32, #tpu.memory_space<vmem>>, vector<1x8x1xf32>
    %96 = vector.shape_cast %95 : vector<1x8x1xf32> to vector<8x1xf32>
    %97 = arith.mulf %91, %96 : vector<8x1xf32>
    %cst_65 = arith.constant dense<0.000000e+00> : vector<8xf32>
    %98 = vector.multi_reduction <add>, %94, %cst_65 [1] : vector<8x8xf32> to vector<8xf32>
    %99 = vector.shape_cast %98 : vector<8xf32> to vector<8x1xf32>
    %100 = arith.addf %97, %99 : vector<8x1xf32>
    %c2_66 = arith.constant 2 : index
    %c0_67 = arith.constant 0 : index
    %c0_68 = arith.constant 0 : index
    %101 = vector.load %arg17[%c2_66, %c0_67, %c0_68] : memref<4x8x1xf32, #tpu.memory_space<vmem>>, vector<1x8x1xf32>
    %102 = vector.shape_cast %101 : vector<1x8x1xf32> to vector<8x1xf32>
    %103 = vector.shape_cast %100 : vector<8x1xf32> to vector<1x8x1xf32>
    tpu.vector_store %arg17[%c2_66, %c0_67, %c0_68], %103 {strides = array<i32>} : memref<4x8x1xf32, #tpu.memory_space<vmem>>, vector<1x8x1xf32>,
    %c2_69 = arith.constant 2 : index
    %c0_70 = arith.constant 0 : index
    %c0_71 = arith.constant 0 : index
    %104 = vector.load %arg16[%c2_69, %c0_70, %c0_71] : memref<4x8x1xf32, #tpu.memory_space<vmem>>, vector<1x8x1xf32>
    %105 = vector.shape_cast %104 : vector<1x8x1xf32> to vector<8x1xf32>
    %106 = vector.shape_cast %89 : vector<8x1xf32> to vector<1x8x1xf32>
    tpu.vector_store %arg16[%c2_69, %c0_70, %c0_71], %106 {strides = array<i32>} : memref<4x8x1xf32, #tpu.memory_space<vmem>>, vector<1x8x1xf32>,
    %cst_72 = arith.constant dense<0.000000e+00> : vector<8x16xf32>
    %107 = tpu.matmul %94, %83, %cst_72 {dimension_numbers = #tpu.dot_dimension_numbers<[1], [0], [0], [1], [0, 0, 1, 1], [], []>} : vector<8x8xf32>, vector<8x16xf32>, vector<8x16xf32> -> vector<8x16xf32>
    %c0_73 = arith.constant 0 : index
    %c32_74 = arith.constant 32 : index
    %108 = vector.load %arg18[%c0_73, %c32_74] : memref<8x64xf32, #tpu.memory_space<vmem>>, vector<8x16xf32>
    %109 = vector.broadcast %91 : vector<8x1xf32> to vector<8x16xf32>
    %110 = arith.mulf %109, %108 : vector<8x16xf32>
    %111 = arith.addf %110, %107 : vector<8x16xf32>
    %c0_75 = arith.constant 0 : index
    %c32_76 = arith.constant 32 : index
    %112 = vector.load %arg18[%c0_75, %c32_76] : memref<8x64xf32, #tpu.memory_space<vmem>>, vector<8x16xf32>
    tpu.vector_store %arg18[%c0_75, %c32_76], %111 {strides = array<i32>} : memref<8x64xf32, #tpu.memory_space<vmem>>, vector<8x16xf32>,
    %c0_77 = arith.constant 0 : index
    %c48 = arith.constant 48 : index
    %113 = vector.load %arg15[%c0_77, %c48] : memref<8x64xf32, #tpu.memory_space<vmem>>, vector<8x16xf32>
    %114 = vector.extract_strided_slice %11 {offsets = [0, 48], sizes = [8, 16], strides = [1, 1]} : vector<8x64xf32> to vector<8x16xf32>
    %115 = vector.extract_strided_slice %16 {offsets = [0, 48], sizes = [8, 16], strides = [1, 1]} : vector<8x64xf32> to vector<8x16xf32>
    %cst_78 = arith.constant dense<0.000000e+00> : vector<8x8xf32>
    %116 = tpu.matmul %113, %114, %cst_78 {dimension_numbers = #tpu.dot_dimension_numbers<[1], [1], [0], [0], [0, 0, 1, 0], [], []>} : vector<8x16xf32>, vector<8x16xf32>, vector<8x8xf32> -> vector<8x8xf32>
    %c3 = arith.constant 3 : index
    %c0_79 = arith.constant 0 : index
    %c0_80 = arith.constant 0 : index
    %117 = vector.load %arg16[%c3, %c0_79, %c0_80] : memref<4x8x1xf32, #tpu.memory_space<vmem>>, vector<1x8x1xf32>
    %118 = vector.shape_cast %117 : vector<1x8x1xf32> to vector<8x1xf32>
    %cst_81 = arith.constant dense<0xFF800000> : vector<8xf32>
    %119 = vector.multi_reduction <maximumf>, %116, %cst_81 [1] : vector<8x8xf32> to vector<8xf32>
    %120 = vector.shape_cast %119 : vector<8xf32> to vector<8x1xf32>
    %121 = arith.maximumf %118, %120 : vector<8x1xf32>
    %122 = arith.subf %118, %121 : vector<8x1xf32>
    %123 = math.exp %122 : vector<8x1xf32>
    %124 = vector.broadcast %121 : vector<8x1xf32> to vector<8x8xf32>
    %125 = arith.subf %116, %124 : vector<8x8xf32>
    %126 = math.exp %125 : vector<8x8xf32>
    %c3_82 = arith.constant 3 : index
    %c0_83 = arith.constant 0 : index
    %c0_84 = arith.constant 0 : index
    %127 = vector.load %arg17[%c3_82, %c0_83, %c0_84] : memref<4x8x1xf32, #tpu.memory_space<vmem>>, vector<1x8x1xf32>
    %128 = vector.shape_cast %127 : vector<1x8x1xf32> to vector<8x1xf32>
    %129 = arith.mulf %123, %128 : vector<8x1xf32>
    %cst_85 = arith.constant dense<0.000000e+00> : vector<8xf32>
    %130 = vector.multi_reduction <add>, %126, %cst_85 [1] : vector<8x8xf32> to vector<8xf32>
    %131 = vector.shape_cast %130 : vector<8xf32> to vector<8x1xf32>
    %132 = arith.addf %129, %131 : vector<8x1xf32>
    %c3_86 = arith.constant 3 : index
    %c0_87 = arith.constant 0 : index
    %c0_88 = arith.constant 0 : index
    %133 = vector.load %arg17[%c3_86, %c0_87, %c0_88] : memref<4x8x1xf32, #tpu.memory_space<vmem>>, vector<1x8x1xf32>
    %134 = vector.shape_cast %133 : vector<1x8x1xf32> to vector<8x1xf32>
    %135 = vector.shape_cast %132 : vector<8x1xf32> to vector<1x8x1xf32>
    tpu.vector_store %arg17[%c3_86, %c0_87, %c0_88], %135 {strides = array<i32>} : memref<4x8x1xf32, #tpu.memory_space<vmem>>, vector<1x8x1xf32>,
    %c3_89 = arith.constant 3 : index
    %c0_90 = arith.constant 0 : index
    %c0_91 = arith.constant 0 : index
    %136 = vector.load %arg16[%c3_89, %c0_90, %c0_91] : memref<4x8x1xf32, #tpu.memory_space<vmem>>, vector<1x8x1xf32>
    %137 = vector.shape_cast %136 : vector<1x8x1xf32> to vector<8x1xf32>
    %138 = vector.shape_cast %121 : vector<8x1xf32> to vector<1x8x1xf32>
    tpu.vector_store %arg16[%c3_89, %c0_90, %c0_91], %138 {strides = array<i32>} : memref<4x8x1xf32, #tpu.memory_space<vmem>>, vector<1x8x1xf32>,
    %cst_92 = arith.constant dense<0.000000e+00> : vector<8x16xf32>
    %139 = tpu.matmul %126, %115, %cst_92 {dimension_numbers = #tpu.dot_dimension_numbers<[1], [0], [0], [1], [0, 0, 1, 1], [], []>} : vector<8x8xf32>, vector<8x16xf32>, vector<8x16xf32> -> vector<8x16xf32>
    %c0_93 = arith.constant 0 : index
    %c48_94 = arith.constant 48 : index
    %140 = vector.load %arg18[%c0_93, %c48_94] : memref<8x64xf32, #tpu.memory_space<vmem>>, vector<8x16xf32>
    %141 = vector.broadcast %123 : vector<8x1xf32> to vector<8x16xf32>
    %142 = arith.mulf %141, %140 : vector<8x16xf32>
    %143 = arith.addf %142, %139 : vector<8x16xf32>
    %c0_95 = arith.constant 0 : index
    %c48_96 = arith.constant 48 : index
    %144 = vector.load %arg18[%c0_95, %c48_96] : memref<8x64xf32, #tpu.memory_space<vmem>>, vector<8x16xf32>
    tpu.vector_store %arg18[%c0_95, %c48_96], %143 {strides = array<i32>} : memref<8x64xf32, #tpu.memory_space<vmem>>, vector<8x16xf32>,
    %c0_i32_97 = arith.constant 0 : i32
    %145 = arith.cmpi eq, %arg2, %c0_i32_97 : i32
    %146 = arith.extui %145 : i1 to i32
    %c0_i32_98 = arith.constant 0 : i32
    %147 = arith.cmpi ne, %146, %c0_i32_98 : i32
    scf.if %147 {
      %c0_99 = arith.constant 0 : index
      %c0_100 = arith.constant 0 : index
      %c0_101 = arith.constant 0 : index
      %148 = vector.load %arg17[%c0_99, %c0_100, %c0_101] : memref<4x8x1xf32, #tpu.memory_space<vmem>>, vector<1x8x1xf32>
      %149 = vector.shape_cast %148 : vector<1x8x1xf32> to vector<8x1xf32>
      %cst_102 = arith.constant 1.000000e+00 : f32
      %150 = vector.broadcast %cst_102 : f32 to vector<8x1xf32>
      %151 = arith.divf %150, %149 : vector<8x1xf32>
      %c0_103 = arith.constant 0 : index
      %c0_104 = arith.constant 0 : index
      %152 = vector.load %arg18[%c0_103, %c0_104] : memref<8x64xf32, #tpu.memory_space<vmem>>, vector<8x16xf32>
      %153 = vector.broadcast %151 : vector<8x1xf32> to vector<8x16xf32>
      %154 = arith.mulf %152, %153 : vector<8x16xf32>
      %c0_105 = arith.constant 0 : index
      %c0_106 = arith.constant 0 : index
      %155 = vector.load %arg18[%c0_105, %c0_106] : memref<8x64xf32, #tpu.memory_space<vmem>>, vector<8x16xf32>
      tpu.vector_store %arg18[%c0_105, %c0_106], %154 {strides = array<i32>} : memref<8x64xf32, #tpu.memory_space<vmem>>, vector<8x16xf32>,
      %c1_107 = arith.constant 1 : index
      %c0_108 = arith.constant 0 : index
      %c0_109 = arith.constant 0 : index
      %156 = vector.load %arg17[%c1_107, %c0_108, %c0_109] : memref<4x8x1xf32, #tpu.memory_space<vmem>>, vector<1x8x1xf32>
      %157 = vector.shape_cast %156 : vector<1x8x1xf32> to vector<8x1xf32>
      %cst_110 = arith.constant 1.000000e+00 : f32
      %158 = vector.broadcast %cst_110 : f32 to vector<8x1xf32>
      %159 = arith.divf %158, %157 : vector<8x1xf32>
      %c0_111 = arith.constant 0 : index
      %c16_112 = arith.constant 16 : index
      %160 = vector.load %arg18[%c0_111, %c16_112] : memref<8x64xf32, #tpu.memory_space<vmem>>, vector<8x16xf32>
      %161 = vector.broadcast %159 : vector<8x1xf32> to vector<8x16xf32>
      %162 = arith.mulf %160, %161 : vector<8x16xf32>
      %c0_113 = arith.constant 0 : index
      %c16_114 = arith.constant 16 : index
      %163 = vector.load %arg18[%c0_113, %c16_114] : memref<8x64xf32, #tpu.memory_space<vmem>>, vector<8x16xf32>
      tpu.vector_store %arg18[%c0_113, %c16_114], %162 {strides = array<i32>} : memref<8x64xf32, #tpu.memory_space<vmem>>, vector<8x16xf32>,
      %c2_115 = arith.constant 2 : index
      %c0_116 = arith.constant 0 : index
      %c0_117 = arith.constant 0 : index
      %164 = vector.load %arg17[%c2_115, %c0_116, %c0_117] : memref<4x8x1xf32, #tpu.memory_space<vmem>>, vector<1x8x1xf32>
      %165 = vector.shape_cast %164 : vector<1x8x1xf32> to vector<8x1xf32>
      %cst_118 = arith.constant 1.000000e+00 : f32
      %166 = vector.broadcast %cst_118 : f32 to vector<8x1xf32>
      %167 = arith.divf %166, %165 : vector<8x1xf32>
      %c0_119 = arith.constant 0 : index
      %c32_120 = arith.constant 32 : index
      %168 = vector.load %arg18[%c0_119, %c32_120] : memref<8x64xf32, #tpu.memory_space<vmem>>, vector<8x16xf32>
      %169 = vector.broadcast %167 : vector<8x1xf32> to vector<8x16xf32>
      %170 = arith.mulf %168, %169 : vector<8x16xf32>
      %c0_121 = arith.constant 0 : index
      %c32_122 = arith.constant 32 : index
      %171 = vector.load %arg18[%c0_121, %c32_122] : memref<8x64xf32, #tpu.memory_space<vmem>>, vector<8x16xf32>
      tpu.vector_store %arg18[%c0_121, %c32_122], %170 {strides = array<i32>} : memref<8x64xf32, #tpu.memory_space<vmem>>, vector<8x16xf32>,
      %c3_123 = arith.constant 3 : index
      %c0_124 = arith.constant 0 : index
      %c0_125 = arith.constant 0 : index
      %172 = vector.load %arg17[%c3_123, %c0_124, %c0_125] : memref<4x8x1xf32, #tpu.memory_space<vmem>>, vector<1x8x1xf32>
      %173 = vector.shape_cast %172 : vector<1x8x1xf32> to vector<8x1xf32>
      %cst_126 = arith.constant 1.000000e+00 : f32
      %174 = vector.broadcast %cst_126 : f32 to vector<8x1xf32>
      %175 = arith.divf %174, %173 : vector<8x1xf32>
      %c0_127 = arith.constant 0 : index
      %c48_128 = arith.constant 48 : index
      %176 = vector.load %arg18[%c0_127, %c48_128] : memref<8x64xf32, #tpu.memory_space<vmem>>, vector<8x16xf32>
      %177 = vector.broadcast %175 : vector<8x1xf32> to vector<8x16xf32>
      %178 = arith.mulf %176, %177 : vector<8x16xf32>
      %c0_129 = arith.constant 0 : index
      %c48_130 = arith.constant 48 : index
      %179 = vector.load %arg18[%c0_129, %c48_130] : memref<8x64xf32, #tpu.memory_space<vmem>>, vector<8x16xf32>
      tpu.vector_store %arg18[%c0_129, %c48_130], %178 {strides = array<i32>} : memref<8x64xf32, #tpu.memory_space<vmem>>, vector<8x16xf32>,
      %c0_131 = arith.constant 0 : index
      %c0_132 = arith.constant 0 : index
      %180 = vector.load %arg18[%c0_131, %c0_132] : memref<8x64xf32, #tpu.memory_space<vmem>>, vector<8x64xf32>
      %c0_133 = arith.constant 0 : index
      %c0_134 = arith.constant 0 : index
      %181 = vector.load %arg12[%c0_133, %c0_134] : memref<64x32xf32, #tpu.memory_space<vmem>>, vector<64x32xf32>
      %cst_135 = arith.constant dense<0.000000e+00> : vector<8x32xf32>
      %182 = tpu.matmul %180, %181, %cst_135 {dimension_numbers = #tpu.dot_dimension_numbers<[1], [0], [0], [1], [0, 0, 1, 1], [], []>} : vector<8x64xf32>, vector<64x32xf32>, vector<8x32xf32> -> vector<8x32xf32>
      %c0_136 = arith.constant 0 : index
      %c0_137 = arith.constant 0 : index
      %183 = vector.load %arg13[%c0_136, %c0_137] : memref<1x32xf32, #tpu.memory_space<vmem>>, vector<1x32xf32>
      %184 = vector.broadcast %183 : vector<1x32xf32> to vector<8x32xf32>
      %185 = arith.addf %182, %184 : vector<8x32xf32>
      %c0_138 = arith.constant 0 : index
      %c0_139 = arith.constant 0 : index
      %c0_140 = arith.constant 0 : index
      %186 = vector.load %arg14[%c0_138, %c0_139, %c0_140] : memref<1x8x32xf32, #tpu.memory_space<vmem>>, vector<1x8x32xf32>
      %187 = vector.shape_cast %186 : vector<1x8x32xf32> to vector<8x32xf32>
      %188 = vector.shape_cast %185 : vector<8x32xf32> to vector<1x8x32xf32>
      tpu.vector_store %arg14[%c0_138, %c0_139, %c0_140], %188 {strides = array<i32>} : memref<1x8x32xf32, #tpu.memory_space<vmem>>, vector<1x8x32xf32>,
    } else {
    }
    return
  }
  func.func @transform_0(%arg0: i32, %arg1: i32, %arg2: i32) -> (i32, i32, i32) {
    %c0_i32 = arith.constant 0 : i32
    %c0_i32_0 = arith.constant 0 : i32
    return %arg0, %arg1, %c0_i32 : i32, i32, i32
  }
  func.func @transform_1(%arg0: i32, %arg1: i32, %arg2: i32) -> (i32, i32, i32) {
    %c0_i32 = arith.constant 0 : i32
    %c0_i32_0 = arith.constant 0 : i32
    return %arg0, %arg2, %c0_i32 : i32, i32, i32
  }
  func.func @transform_2(%arg0: i32, %arg1: i32, %arg2: i32) -> (i32, i32, i32) {
    %c0_i32 = arith.constant 0 : i32
    %c0_i32_0 = arith.constant 0 : i32
    return %arg0, %arg2, %c0_i32 : i32, i32, i32
  }
  func.func @transform_3(%arg0: i32, %arg1: i32, %arg2: i32) -> (i32, i32) {
    %c0_i32 = arith.constant 0 : i32
    %c0_i32_0 = arith.constant 0 : i32
    %c0_i32_1 = arith.constant 0 : i32
    return %c0_i32, %c0_i32_0 : i32, i32
  }
  func.func @transform_4(%arg0: i32, %arg1: i32, %arg2: i32) -> (i32, i32) {
    %c0_i32 = arith.constant 0 : i32
    %c0_i32_0 = arith.constant 0 : i32
    %c0_i32_1 = arith.constant 0 : i32
    return %c0_i32, %c0_i32_0 : i32, i32
  }
  func.func @transform_5(%arg0: i32, %arg1: i32, %arg2: i32) -> (i32, i32) {
    %c0_i32 = arith.constant 0 : i32
    %c0_i32_0 = arith.constant 0 : i32
    %c0_i32_1 = arith.constant 0 : i32
    return %c0_i32, %c0_i32_0 : i32, i32
  }
  func.func @transform_6(%arg0: i32, %arg1: i32, %arg2: i32) -> (i32, i32) {
    %c0_i32 = arith.constant 0 : i32
    %c0_i32_0 = arith.constant 0 : i32
    %c0_i32_1 = arith.constant 0 : i32
    return %c0_i32, %c0_i32_0 : i32, i32
  }
  func.func @transform_7(%arg0: i32, %arg1: i32, %arg2: i32) -> (i32, i32) {
    %c0_i32 = arith.constant 0 : i32
    %c0_i32_0 = arith.constant 0 : i32
    %c0_i32_1 = arith.constant 0 : i32
    return %c0_i32, %c0_i32_0 : i32, i32
  }
  func.func @transform_8(%arg0: i32, %arg1: i32, %arg2: i32) -> (i32, i32) {
    %c0_i32 = arith.constant 0 : i32
    %c0_i32_0 = arith.constant 0 : i32
    %c0_i32_1 = arith.constant 0 : i32
    return %c0_i32, %c0_i32_0 : i32, i32
  }
  func.func @transform_9(%arg0: i32, %arg1: i32, %arg2: i32) -> (i32, i32) {
    %c0_i32 = arith.constant 0 : i32
    %c0_i32_0 = arith.constant 0 : i32
    %c0_i32_1 = arith.constant 0 : i32
    return %c0_i32, %c0_i32_0 : i32, i32
  }
  func.func @transform_10(%arg0: i32, %arg1: i32, %arg2: i32) -> (i32, i32) {
    %c0_i32 = arith.constant 0 : i32
    %c0_i32_0 = arith.constant 0 : i32
    %c0_i32_1 = arith.constant 0 : i32
    return %c0_i32, %c0_i32_0 : i32, i32
  }
  func.func @transform_11(%arg0: i32, %arg1: i32, %arg2: i32) -> (i32, i32, i32) {
    %c0_i32 = arith.constant 0 : i32
    %c0_i32_0 = arith.constant 0 : i32
    return %arg0, %arg1, %c0_i32 : i32, i32, i32
  }
}

</mosaic_0001>

<bundles_post_ra>
// kernel: tpu_custom_call.1
= control target key start
LH: loop header
LB: loop body
LE: loop exit
PB: predicated region body
PF: predicated region fallthrough
CT: control target
= control target key end

     0   :  { %s1987_s0 = inlined_call_operand.hbm [shape: f32[2,8,32], index: 0, kind: input, shape index: {}]   ;;  %s1988_s1 = inlined_call_operand.hbm [shape: f32[2,8,32], index: 1, kind: input, shape index: {}]   ;;  %s1989_s2 = inlined_call_operand.hbm [shape: f32[2,8,32], index: 2, kind: input, shape index: {}]   ;;  %s1990_s3 = inlined_call_operand.vmem [shape: f32[32,64], index: 3, kind: input, shape index: {}]   ;;  %s1991_s4 = inlined_call_operand.vmem [shape: f32[1,64], index: 4, kind: input, shape index: {}]   ;;  %s1992_s5 = inlined_call_operand.vmem [shape: f32[32,64], index: 5, kind: input, shape index: {}]   ;;  %s1993_s6 = inlined_call_operand.vmem [shape: f32[1,64], index: 6, kind: input, shape index: {}]   ;;  %s1994_s7 = inlined_call_operand.vmem [shape: f32[32,64], index: 7, kind: input, shape index: {}]   ;;  %s1995_s8 = inlined_call_operand.vmem [shape: f32[1,64], index: 8, kind: input, shape index: {}]   ;;  %s1996_s9 = inlined_call_operand.vmem [shape: f32[64,32], index: 9, kind: input, shape index: {}]   ;;  %s1997_s10 = inlined_call_operand.vmem [shape: f32[1,32], index: 10, kind: input, shape index: {}]   ;;  %s1998_s11 = inlined_call_operand.hbm [shape: f32[2,8,32], index: 11, kind: output, shape index: {}]  }
   0x1   :  { %2009 = sst [smem:[#allocation25_spill]] %s1988_s1 }
   0x2   :  { %2010 = sst [smem:[#allocation26_spill]] %s1997_s10 }
   0x3   :  { %2011 = sst [smem:[#allocation27_spill]] %s1998_s11 }
   0x4   :  { %16 = vsyncpa [#allocation7], 0 }
   0x5   :  { %18 = vsyncpa [#allocation7 + $0x1], 0 }
   0x6   :  { %19 = vsyncpa [#allocation10], 0 }
   0x7   :  { %21 = vsyncpa [#allocation10 + $0x1], 0 }
   0x8   :  { %22 = vsyncpa [#allocation8], 0 }
   0x9   :  { %24 = vsyncpa [#allocation8 + $0x1], 0  ;;  %s1674_s17 = smov 0   ;;  %s1676_s18 = smov 0  }
   0xa   :  { %s1678_s19 = smov 0   ;;  %s1680_s20 = smov 0  }
   0xb   :  { %s1682_s21 = smov 0   ;;  %s1684_s22 = smov 0  }
   0xc LB: > { %2012 = sst [smem:[#allocation16_spill]] %s1583_s17  ;;  %s1705_s23 = sadd.s32 4294967295, %s1603_s22   ;;  %s1603_s22 = sphi %s1684_s22, %s30_s22   ;;  %s1599_s21 = sphi %s1682_s21, %s2038_s21   ;;  %s1595_s20 = sphi %s1680_s20, %s2037_s20   ;;  %s1591_s19 = sphi %s1678_s19, %s2036_s19   ;;  %s1587_s18 = sphi %s1676_s18, %s2040_s18   ;;  %s1583_s17 = sphi %s1674_s17, %s2039_s17  }
   0xd   : > { %2013 = sst [smem:[#allocation17_spill]] %s1591_s19  ;;  %s1281_s24 = sadd.s32 4294967294, %s1603_s22  }
   0xe   : > { %2014 = sst [smem:[#allocation18_spill]] %s1595_s20  ;;  %s49_s25 = sadd.s32 1, %s1599_s21 }
   0xf   : > { %2015 = sst [smem:[#allocation19_spill]] %s1599_s21  ;;  %s58_s26 = sadd.s32 1, %s1591_s19 }
  0x10   : > { %2016 = sst [smem:[#allocation20_spill]] %s1603_s22  ;;  %p51_p0 = scmp.ge.s32.totalorder %s49_s25, 2 }
  0x11   : > { %p65_p1 = scmp.ne.s32.totalorder %s1591_s19, %s1587_s18  ;;  %p66_p2 = scmp.eq.s32.totalorder %s1603_s22, 0 }
  0x12   : > { %p71_p3 = scmp.ne.s32.totalorder %s1587_s18, %s1583_s17  ;;  %s2042_s25 = smov (%p51_p0, %s49_s25), 0 }
  0x13   : > { %2017 = sst [smem:[#allocation21_spill]] %s2042_s25  ;;  %p1717_p4 = por %p66_p2, %p65_p1 }
  0x14   : > { %p72_p5 = scmp.eq.s32.totalorder %s1705_s23, 0  ;;  %s53_s28 = ssub.s32 %s1599_s21, %s2042_s25 }
  0x15   : > { %p321_p6 = scmp.eq.s32.totalorder %s1705_s23, 1  ;;  %p56_p7 = scmp.eq.s32.totalorder %s53_s28, 0 }
  0x16   : > { %p1725_p8 = por %p72_p5, %p71_p3  ;;  %p327_p10 = scmp.eq.s32.totalorder %s1281_s24, 1 }
  0x17   : > { %p1729_p9 = por %p321_p6, %p65_p1  ;;  %p1283_p12 = scmp.ge.s32.totalorder %s1603_s22, 2 }
  0x18   : > { %s1734_s12 = scalar_select %p56_p7, %s1591_s19, %s58_s26  }
  0x19   : > { %s2020_s30 = scalar_select %p1729_p9, 1, 0 }
  0x1a   : > { %2022 = sst [smem:[#allocation23_spill]] %s1734_s12  ;;  %p1736_p11 = por %p327_p10, %p71_p3 }
  0x1b   : > { %2021 = sst [smem:[#allocation22_spill]] %s2020_s30  ;;  %p1337_p13 = scmp.lt.s32.totalorder %s1603_s22, 2 }
  0x1c   : > { %s2023_s13 = scalar_select %p1736_p11, 1, 0 }
  0x1d   : > { %s371_s14 = sand.u32 1, %s1591_s19   ;;  %s1285_s16 = sshll.u32 %s1599_s21, 3 }
  0x1e   : > { %2024 = sst [smem:[#allocation24_spill]] %s2023_s13  ;;  %s1284_s15 = sshll.u32 %s371_s14, 3 }
  0x1f   : > { %p1746_p0 = pnand %p1337_p13, %p1717_p4  ;;  %s391_s24 = sand.u32 1, %s1603_s22  }
  0x20   : > { %s2026_s1 = sld [smem:[#allocation25_spill]]  ;;  %s395_s13 = scalar_lea.vmem [#allocation9], %s1284_s15 }
  0x21   : > { %s404_s10 = sshll.u32 %s395_s13, 4  ;;  %s392_s19 = scalar_lea.sflag [#allocation10], %s391_s24  ;;  %s405_s10 = int_to_ptr.vmem [resolvable:$true] %s404_s10 }
  0x22   : > { %p1290_p1 = scmp.ge.s32.totalorder %s1603_s22, 1  ;;  %p429_p2 = scmp.lt.s32.totalorder %s1603_s22, 3 }
  0x23   : > { %s380_s25 = scalar_lea.hbm %s1987_s0, %s1285_s16  ;;  %s375_s26 = scalar_lea.vmem [#allocation6], %s1284_s15 }
  0x24   : > { %p1758_p3 = pnand %p1290_p1, %p429_p2  ;;  %s372_s13 = scalar_lea.sflag [#allocation7], %s371_s14 }
  0x25   : > { %s420_s24 = scalar_lea.hbm %s1989_s2, %s1285_s16  ;;  %s415_s11 = scalar_lea.vmem [#allocation11], %s1284_s15 }
  0x26   : > { %s400_s12 = scalar_lea.hbm %s2026_s1, %s1285_s16  ;;  %s384_s1 = sshll.u32 %s375_s26, 4  ;;  %s385_s1 = int_to_ptr.vmem [resolvable:$true] %s384_s1 }
  0x27   : > { %s402_s17 = sshll.u32 %s400_s12, 4  ;;  %s382_s12 = sshll.u32 %s380_s25, 4  ;;  %s403_s17 = int_to_ptr.hbm [resolvable:$true] %s402_s17  ;;  %s383_s12 = int_to_ptr.hbm [resolvable:$true] %s382_s12 }
  0x28   : > { %1329 = dma.hbm_to_vmem [thread:$0]  (!%p1746_p0), %s403_s17, 128, %s405_s10, %s392_s19  }
  0x29   : > { %1326 = dma.hbm_to_vmem [thread:$0]  (!%p1746_p0), %s383_s12, 128, %s385_s1, %s372_s13  }
  0x2a   : > { %s422_s22 = sshll.u32 %s420_s24, 4  ;;  %s424_s20 = sshll.u32 %s415_s11, 4  ;;  %s423_s22 = int_to_ptr.hbm [resolvable:$true] %s422_s22  ;;  %s425_s20 = int_to_ptr.vmem [resolvable:$true] %s424_s20 }
  0x2b   : > { %1332 = dma.hbm_to_vmem [thread:$0]  (!%p1746_p0), %s423_s22, 128, %s425_s20, %s392_s19  }
  0x2c   : > { %433 = sbr.rel (%p1758_p3) target bundleno = 1381 (0x565), region = 64  ;;  %s1775_s21 = sand.u32 (!%p1758_p3), 1, %s1587_s18  }
  0x2d   : > { %s1778_s1 = sshll.u32 (!%p1758_p3), %s1775_s21, 3  ;;  %s436_s30 = scalar_lea.sflag (!%p1758_p3), [#allocation7], %s1775_s21 }
  0x2e   : > { %s439_s14 = scalar_lea.vmem (!%p1758_p3), [#allocation6], %s1778_s1 }
  0x31   : > { %1570 = dma.done.wait (%p1725_p8), %s436_s30, 128  }
  0x32   : > { %1572 = vsyncadd (%p1725_p8), %s436_s30, 4294967168  ;;  %s445_s11 = sand.u32 1, %s1705_s23   ;;  %s449_s20 = scalar_lea.vmem [#allocation9], %s1778_s1 }
  0x33   : > { %s446_s19 = scalar_lea.sflag [#allocation10], %s445_s11 }
  0x34   : > { %1574 = dma.done.wait (%p1725_p8), %s446_s19, 256  }
  0x35   : > { %1576 = vsyncadd (%p1725_p8), %s446_s19, 4294967040  ;;  %v517_v0 = vld [vmem:[%s1990_s3 + $0x18] sm:$0xff]  ;;  %v516_v2 = vld [vmem:[%s1990_s3 + $0x10] sm:$0xff]  ;;  %vm522_vm0 = vcmask 261120   ;;  %vm546_vm1 = vcmask 523264   ;;  %v1605_v15 = vmov 0.0  }
  0x36   : > { %v563_v1 = vld [vmem:[%s1992_s5 + $0x18] sm:$0xff]  ;;  %538 = vmatpush.msra.mxu0 %v517_v0  ;;  %v562_v3 = vld [vmem:[%s1992_s5 + $0x10] sm:$0xff]  ;;  %v515_v4 = vld [vmem:[%s1990_s3 + $0x8] sm:$0xff]  ;;  %557 = vst.msk [vmem:[#allocation5] sm:$0xff] %vm546_vm1, %v1605_v15  ;;  %vm624_vm2 = vcmask 130048   ;;  %s1606_s13 = smov 112  }
  0x37   : > { %584 = vmatpush.msra.mxu1 %v563_v1  ;;  %v561_v5 = vld [vmem:[%s1992_s5 + $0x8] sm:$0xff]  ;;  %v595_v6 = vld [vmem:[%s1994_s7 + $0x18] sm:$0xff]  ;;  %v594_v7 = vld [vmem:[%s1994_s7 + $0x10] sm:$0xff]  ;;  %s1607_s10 = smov 96   ;;  %s1608_s17 = smov 80   ;;  %vm652_vm3 = vcmask 64512  }
  0x38   : > { %539 = vmatpush.msra.mxu0 %v516_v2  ;;  %v514_v8 = vld [vmem:[%s1990_s3] sm:$0xff]  ;;  %v513_v10 = vld [vmem:[%s439_s14] sm:$0xff]  ;;  %615 = vmatpush.msra.mxu2 %v595_v6  ;;  %v593_v12 = vld [vmem:[%s1994_s7 + $0x8] sm:$0xff]  ;;  %s459_s14 = scalar_lea.vmem [#allocation11], %s1778_s1  ;;  %vm548_vm4 = vcmask 7168   ;;  %v1609_v34 = vmov -inf  }
  0x39   : > { %585 = vmatpush.msra.mxu1 %v562_v3  ;;  %v560_v9 = vld [vmem:[%s1992_s5] sm:$0xff]  ;;  %v559_v14 = vld [vmem:[%s459_s14] sm:$0xff]  ;;  %549 = vst.msk [vmem:[#allocation3] sm:$0xff] %vm548_vm4, %v1609_v34  ;;  %v1610_v35 = vmov 0   ;;  %s1611_s11 = smov 16   ;;  %s1612_s19 = smov 32  }
  0x3a   : > { %540 = vmatpush.msra.mxu0 %v515_v4  ;;  %v558_v11 = vld [vmem:[%s449_s20] sm:$0xff]  ;;  %616 = vmatpush.msra.mxu2 %v594_v7  ;;  %550 = vst.msk [vmem:[#allocation3 + $0x8] sm:$0xff] %vm548_vm4, %v1609_v34  ;;  %s1613_s22 = smov 48   ;;  %s2029_s16 = sld [smem:[#allocation27_spill]] }
  0x3b   : > { %586 = vmatpush.msra.mxu1 %v561_v5  ;;  %v592_v13 = vld [vmem:[%s1994_s7] sm:$0xff]  ;;  %551 = vst.msk [vmem:[#allocation3 + $0x10] sm:$0xff] %vm548_vm4, %v1609_v34  ;;  %1396 = vset.pattern.permute.xlu0 %v1610_v35  ;;  %s2031_s14 = sld [smem:[#allocation26_spill]]  ;;  %s508_s20 = scalar_lea.vmem [#allocation12], %s1778_s1 }
  0x3c   : > { %541 = vmatpush.msra.mxu0 %v514_v8  ;;  %617 = vmatpush.msra.mxu2 %v593_v12  ;;  %v1399_v16 = vld [vmem:[%s1991_s4] ss:$0 sm:$0xff]  ;;  %552 = vst.msk [vmem:[#allocation3 + $0x18] sm:$0xff] %vm548_vm4, %v1609_v34  ;;  %s1149_s12 = sshll.u32 %s508_s20, 4  ;;  %s1136_s26 = scalar_lea.sflag [#allocation8], %s1775_s21  ;;  %s1150_s12 = int_to_ptr.vmem [resolvable:$true] %s1149_s12 }
  0x3d   : > { %587 = vmatpush.msra.mxu1 %v560_v9  ;;  %1295 = vmatmul.msk.f32.vlgmr.msra.gmra.mxu0 %vm522_vm0, %v513_v10  ;;  %v1400_v17 = vld [vmem:[%s1993_s6] ss:$0 sm:$0xff]  ;;  %553 = vst.msk [vmem:[#allocation4] sm:$0xff] %vm548_vm4, %v1605_v15  ;;  %v700_v57 = vld [vmem:[#allocation5] sm:$0xff] }
  0x3e   : > { %1296 = vmatmul.msk.f32.vlgmr.msra.gmra.mxu1 %vm522_vm0, %v558_v11  ;;  %618 = vmatpush.msra.mxu2 %v592_v13  ;;  %v1401_v23 = vld [vmem:[%s1995_s8] ss:$0 sm:$0xff]  ;;  %554 = vst.msk [vmem:[#allocation4 + $0x8] sm:$0xff] %vm548_vm4, %v1605_v15 }
  0x3f   : > { %1297 = vmatmul.msk.f32.vlgmr.msra.gmra.mxu2 %vm522_vm0, %v559_v14  ;;  %555 = vst.msk [vmem:[#allocation4 + $0x10] sm:$0xff] %vm548_vm4, %v1605_v15  ;;  %1397 = vset.pattern.permute.xlu2 %v1610_v35 }
  0x40   : > { %556 = vst.msk [vmem:[#allocation4 + $0x18] sm:$0xff] %vm548_vm4, %v1605_v15  ;;  %1398 = vset.pattern.permute.xlu1 %v1610_v35  ;;  %v651_v38 = vld [vmem:[#allocation3] sm:$0xff]  ;;  %s1537_s1 = scalar_lea.hbm %s2029_s16, 16 }
  0x41   : > { %v740_v46 = vld [vmem:[#allocation3 + $0x8] sm:$0xff] }
  0x42   : > { %v837_v0 = vld [vmem:[#allocation3 + $0x10] sm:$0xff] }
  0x43   : > { %v1882_v53 = vld [vmem:[#allocation3 + $0x18] sm:$0xff] }
  0xba   : > { %v543_v18 = vpop.f32.mrf.mxu0 }
  0xbb   : > { %v589_v19 = vpop.f32.mrf.mxu1  ;;  %v544_v20 = vadd.f32 %v1399_v16, %v543_v18 }
  0xbc   : > { %v590_v21 = vadd.f32 %v1400_v17, %v589_v19 }
  0xbd   : > { %547 = vst.msk [vmem:[#allocation2] sm:$0xff] %vm546_vm1, %v544_v20 }
  0xbe   : > { %713 = vrot.lane.b32.xlu1 %v590_v21, %s1606_s13  ;;  %1298 = vmatpush.xpose.msk.msra.mxu3 %vm624_vm2, %v590_v21 }
  0xc2   : > { %v620_v24 = vpop.f32.mrf.mxu2 }
  0xc3   : > { %v1851_v25 = vadd.f32 %v1401_v23, %v620_v24  ;;  %v757_v23 = vld [vmem:[#allocation4 + $0x8] sm:$0xff] }
  0xc4   : > { %v709_v22 = vld [vmem:[#allocation2] sm:$0xff] }
  0xc5   : > { %711 = vrot.lane.b32.xlu2 %v709_v22, %s1606_s13  ;;  %1299 = vmatmul.msk.f32.vlgmr.msra.gmra.mxu3 %vm624_vm2, %v709_v22 }
  0xc6   : > { %810 = vrot.lane.b32.xlu1 %v590_v21, %s1607_s10  ;;  %695 = vmatpush.msrb.mxu3 %v1851_v25 }
  0xcd   : > { %808 = vrot.lane.b32.xlu2 %v709_v22, %s1607_s10 }
  0xce   : > { %906 = vrot.lane.b32.xlu1 %v590_v21, %s1608_s17 }
  0xd5   : > { %904 = vrot.lane.b32.xlu2 %v709_v22, %s1608_s17 }
 0x11f   : > { %v712_v26 = vpop.permute.xlu2 %711 }
 0x127   : > { %v809_v29 = vpop.permute.xlu2 %808 }
 0x12f   : > { %v905_v31 = vpop.permute.xlu2 %904 }
 0x130   : > { %v714_v27 = vpop.permute.xlu1 %713 }
 0x131   : > { %1301 = vmatpush.xpose.msk.msrb.mxu0 %vm624_vm2, %v714_v27 }
 0x134   : > { %1302 = vmatmul.msk.f32.vlgmr.msrb.gmra.mxu0 %vm624_vm2, %v712_v26 }
 0x138   : > { %v811_v28 = vpop.permute.xlu1 %810 }
 0x139   : > { %1304 = vmatpush.xpose.msk.msra.mxu3 %vm624_vm2, %v811_v28 }
 0x140   : > { %v907_v30 = vpop.permute.xlu1 %906 }
 0x141   : > { %1307 = vmatpush.xpose.msk.msra.mxu0 %vm624_vm2, %v907_v30 }
 0x144   : > { %1308 = vmatmul.msk.f32.vlgmr.msra.gmra.mxu0 %vm624_vm2, %v905_v31 }
 0x148   : > { %v648_v32 = vpop.f32.mrf.mxu3 }
 0x149   : > { %v653_v33 = vsel %vm652_vm3, %v648_v32, -inf }
 0x14a   : > { %654 = vmax.xlane.f32.xlu0 %v653_v33 }
 0x1b1   : > { %v736_v36 = vpop.f32.mrf.mxu0 }
 0x1b2   : > { %v741_v37 = vsel %vm652_vm3, %v736_v36, -inf }
 0x1b3   : > { %742 = vmax.xlane.f32.xlu1 %v741_v37 }
 0x1bd   : > { %v655_v39 = vpop.xlane.xlu0 %654 }
 0x1be   : > { %v656_v40 = vmax.f32 %v651_v38, %v655_v39 }
 0x1c0   : > { %676 = vst.msk [vmem:[#allocation3] sm:$0xff] %vm548_vm4, %v656_v40  ;;  %662 = vperm.xlu0 %1396, %v656_v40   ;;  %v657_v43 = vsub.f32 %v651_v38, %v656_v40  ;;  %v668_v38 = vld [vmem:[#allocation4] sm:$0xff] }
 0x1c1   : > { %v1870_v41 = vpop.f32.mrf.mxu0 }
 0x1c2   : > { %v934_v42 = vsel %vm652_vm3, %v1870_v41, -inf  ;;  %v658_v44 = vmul.f32 1.442695, %v657_v43 }
 0x1c4   : > { %1403 = vpow2.f32 %v658_v44 }
 0x1ca   : > { %v1876_v45 = vpop.eup %1403 }
 0x1cb   : > { %v669_v39 = vmul.f32 %v1876_v45, %v668_v38 }
 0x1ea   : > { %935 = vmax.xlane.f32.xlu0 %v934_v42 }
 0x1fe   : > { %862 = vrot.lane.b32.xlu0 %v1851_v25, %s1607_s10 }
 0x206   : > { %703 = vperm.xlu0 %1396, %v1876_v45  }
 0x226   : > { %v743_v47 = vpop.xlane.xlu1 %742 }
 0x227   : > { %v744_v48 = vmax.f32 %v740_v46, %v743_v47 }
 0x229   : > { %764 = vst.msk [vmem:[#allocation3 + $0x8] sm:$0xff] %vm548_vm4, %v744_v48  ;;  %v745_v11 = vsub.f32 %v740_v46, %v744_v48 }
 0x22b   : > { %v746_v12 = vmul.f32 1.442695, %v745_v11 }
 0x232   : > { %v663_v49 = vpop.permute.xlu0 %662 }
 0x233   : > { %v665_v50 = vsub.f32 %v648_v32, %v663_v49 }
 0x235   : > { %v666_v51 = vmul.f32 1.442695, %v665_v50 }
 0x237   : > { %1405 = vpow2.f32 %v666_v51 }
 0x23d   : > { %v1406_v52 = vpop.eup %1405 }
 0x23e   : > { %1300 = vmatmul.msk.f32.vlgmr.msrb.gmra.mxu3 %vm652_vm3, %v1406_v52  ;;  %v670_v14 = vsel %vm652_vm3, %v1406_v52, 0.0 }
 0x246   : > { %1305 = vmatmul.msk.f32.vlgmr.msra.gmra.mxu3 %vm624_vm2, %v809_v29 }
 0x25d   : > { %v936_v54 = vpop.xlane.xlu0 %935 }
 0x25e   : > { %v1885_v55 = vmax.f32 %v1882_v53, %v936_v54 }
 0x260   : > { %957 = vst.msk [vmem:[#allocation3 + $0x18] sm:$0xff] %vm548_vm4, %v1885_v55  ;;  %v938_v33 = vsub.f32 %v1882_v53, %v1885_v55 }
 0x262   : > { %v939_v35 = vmul.f32 1.442695, %v938_v33 }
 0x270   : > { %v863_v56 = vpop.permute.xlu0 %862 }
 0x271   : > { %883 = vmatpush.msrb.mxu3 %v863_v56 }
 0x278   : > { %v704_v58 = vpop.permute.xlu0 %703 }
 0x279   : > { %v706_v59 = vmul.f32 %v704_v58, %v700_v57 }
 0x2c1   : > { %v697_v60 = vpop.f32.mrf.mxu3 }
 0x2c2   : > { %v707_v61 = vadd.f32 %v706_v59, %v697_v60 }
 0x2c4   : > { %708 = vst.msk [vmem:[#allocation5] sm:$0xff] %vm624_vm2, %v707_v61  ;;  %v854_v61 = vld [vmem:[#allocation4 + $0x10] sm:$0xff] }
 0x2c9   : > { %v833_v62 = vpop.f32.mrf.mxu3 }
 0x2ca   : > { %v838_v63 = vsel %vm652_vm3, %v833_v62, -inf }
 0x2cb   : > { %839 = vmax.xlane.f32.xlu2 %v838_v63 }
 0x2e3   : > { %750 = vperm.xlu2 %1397, %v744_v48  }
 0x2eb   : > { %766 = vrot.lane.b32.xlu2 %v1851_v25, %s1606_s13 }
 0x2f3   : > { %958 = vrot.lane.b32.xlu2 %v1851_v25, %s1608_s17 }
 0x33e   : > { %v840_v1 = vpop.xlane.xlu2 %839 }
 0x33f   : > { %v841_v2 = vmax.f32 %v837_v0, %v840_v1  ;;  %v950_v1 = vld [vmem:[#allocation4 + $0x18] sm:$0xff] }
 0x341   : > { %v842_v3 = vsub.f32 %v837_v0, %v841_v2  ;;  %861 = vst.msk [vmem:[#allocation3 + $0x10] sm:$0xff] %vm548_vm4, %v841_v2  ;;  %847 = vperm.xlu1 %1398, %v841_v2  }
 0x343   : > { %v843_v29 = vmul.f32 1.442695, %v842_v3 }
 0x346   : > { %v751_v4 = vpop.permute.xlu2 %750 }
 0x347   : > { %v753_v5 = vsub.f32 %v736_v36, %v751_v4 }
 0x349   : > { %v754_v6 = vmul.f32 1.442695, %v753_v5  ;;  %943 = vperm.xlu1 %1398, %v1885_v55  }
 0x34b   : > { %1407 = vpow2.f32 %v754_v6 }
 0x34c   : > { %1409 = vpow2.f32 %v746_v12 }
 0x34e   : > { %v767_v7 = vpop.permute.xlu2 %766 }
 0x34f   : > { %787 = vmatpush.msrb.mxu1 %v767_v7 }
 0x351   : > { %v1408_v8 = vpop.eup %1407 }
 0x352   : > { %1303 = vmatmul.msk.f32.vlgmr.msrb.gmra.mxu1 %vm652_vm3, %v1408_v8  ;;  %v759_v9 = vsel %vm652_vm3, %v1408_v8, 0.0  ;;  %v1410_v13 = vpop.eup %1409 }
 0x353   : > { %760 = vadd.xlane.f32.xlu2 %v759_v9  ;;  %v758_v24 = vmul.f32 %v1410_v13, %v757_v23  ;;  %v792_v23 = vld [vmem:[#allocation5] sm:$0xff] }
 0x356   : > { %v959_v10 = vpop.permute.xlu2 %958 }
 0x357   : > { %979 = vmatpush.msra.mxu1 %v959_v10 }
 0x36b   : > { %795 = vperm.xlu2 %1397, %v1410_v13  }
 0x373   : > { %671 = vadd.xlane.f32.xlu1 %v670_v14 }
 0x3b3   : > { %v848_v15 = vpop.permute.xlu1 %847 }
 0x3b4   : > { %v850_v16 = vsub.f32 %v833_v62, %v848_v15 }
 0x3b6   : > { %v851_v17 = vmul.f32 1.442695, %v850_v16 }
 0x3b8   : > { %1411 = vpow2.f32 %v851_v17 }
 0x3bb   : > { %v944_v18 = vpop.permute.xlu1 %943 }
 0x3bc   : > { %v946_v19 = vsub.f32 %v1870_v41, %v944_v18 }
 0x3be   : > { %v1412_v20 = vpop.eup %1411  ;;  %v947_v21 = vmul.f32 1.442695, %v946_v19 }
 0x3bf   : > { %1306 = vmatmul.msk.f32.vlgmr.msrb.gmra.mxu3 %vm652_vm3, %v1412_v20  ;;  %v856_v22 = vsel %vm652_vm3, %v1412_v20, 0.0 }
 0x3c0   : > { %1413 = vpow2.f32 %v947_v21  ;;  %857 = vadd.xlane.f32.xlu0 %v856_v22 }
 0x3c1   : > { %1415 = vpow2.f32 %v843_v29 }
 0x3c6   : > { %v1414_v25 = vpop.eup %1413  ;;  %v761_v26 = vpop.xlane.xlu2 %760 }
 0x3c7   : > { %v762_v27 = vadd.f32 %v761_v26, %v758_v24  ;;  %1309 = vmatmul.msk.f32.vlgmr.msra.gmra.mxu1 %vm652_vm3, %v1414_v25  ;;  %v952_v28 = vsel %vm652_vm3, %v1414_v25, 0.0  ;;  %v1416_v31 = vpop.eup %1415 }
 0x3c8   : > { %953 = vadd.xlane.f32.xlu1 %v952_v28  ;;  %v855_v62 = vmul.f32 %v1416_v31, %v854_v61 }
 0x3c9   : > { %763 = vst.msk [vmem:[#allocation4 + $0x8] sm:$0xff] %vm548_vm4, %v762_v27 }
 0x3ce   : > { %v796_v18 = vpop.permute.xlu2 %795 }
 0x3cf   : > { %v789_v36 = vpop.f32.mrf.mxu1  ;;  %v798_v26 = vmul.f32 %v796_v18, %v792_v23 }
 0x3d0   : > { %v1025_v30 = vld [vmem:[#allocation4 + $0x8] sm:$0xff] }
 0x3d1   : > { %1417 = vrcp.f32 %v1025_v30  ;;  %v1037_v46 = vand.u32 2147483648, %v1025_v30  ;;  %vm1031_vm6 = vweird.f32 %v1025_v30  ;;  %v1035_v47 = vand.u32 2147483647, %v1025_v30 }
 0x3d2   : > { %1419 = vpow2.f32 %v939_v35 }
 0x3d3   : > { %v1038_v49 = vor.u32 1.1754944e-38, %v1037_v46  ;;  %vm1036_vm8 = vcmp.eq.f32.partialorder %v1035_v47, 8.507059e+37  ;;  %v1104_v46 = vld [vmem:[%s1996_s9 + $0x30] sm:$0xff]  ;;  %v1103_v47 = vld [vmem:[%s1996_s9 + $0x28] sm:$0xff] }
 0x3d4   : > { %891 = vperm.xlu0 %1396, %v1416_v31  }
 0x3d7   : > { %v1418_v32 = vpop.eup %1417 }
 0x3d8   : > { %v1027_v34 = vmul.f32 %v1418_v32, %v1025_v30  ;;  %v1420_v43 = vpop.eup %1419  ;;  %vm1032_vm5 = vweird.f32 %v1418_v32 }
 0x3d9   : > { %vm1033_vm7 = vmor %vm1031_vm6, %vm1032_vm5  ;;  %v951_v2 = vmul.f32 %v1420_v43, %v950_v1  ;;  %vm804_vm5 = vcmask 261248   ;;  %v1402_v1 = vld [vmem:[%s2031_s14] ss:$0 sm:$0xff] }
 0x3da   : > { %v1028_v37 = vsub.f32 1.0, %v1027_v34 }
 0x3dc   : > { %v1029_v40 = vmul.f32 %v1418_v32, %v1028_v37 }
 0x3de   : > { %v1030_v44 = vadd.f32 %v1418_v32, %v1029_v40 }
 0x3e0   : > { %v1034_v48 = vsel %vm1033_vm7, %v1418_v32, %v1030_v44  ;;  %v1105_v44 = vld [vmem:[%s1996_s9 + $0x38] sm:$0xff] }
 0x3e1   : > { %800 = vrot.lane.b32.xlu1 %v789_v36, %s1611_s11  ;;  %v1039_v50 = vsel %vm1036_vm8, %v1038_v49, %v1034_v48  ;;  %1122 = vmatpush.msrb.mxu2 %v1105_v44  ;;  %v1102_v48 = vld [vmem:[%s1996_s9 + $0x20] sm:$0xff]  ;;  %s2028_s11 = sld [smem:[#allocation18_spill]] }
 0x3e3   : > { %1123 = vmatpush.msrb.mxu2 %v1104_v46 }
 0x3e5   : > { %1124 = vmatpush.msrb.mxu2 %v1103_v47 }
 0x3e6   : > { %v672_v41 = vpop.xlane.xlu1 %671 }
 0x3e7   : > { %v673_v42 = vadd.f32 %v672_v41, %v669_v39  ;;  %1125 = vmatpush.msrb.mxu2 %v1102_v48 }
 0x3e9   : > { %675 = vst.msk [vmem:[#allocation4] sm:$0xff] %vm548_vm4, %v673_v42  ;;  %987 = vperm.xlu1 %1398, %v1420_v43  }
 0x3f0   : > { %v1001_v51 = vld [vmem:[#allocation4] sm:$0xff] }
 0x3f1   : > { %1044 = vperm.xlu1 %1398, %v1039_v50   ;;  %1421 = vrcp.f32 %v1001_v51  ;;  %v1013_v54 = vand.u32 2147483648, %v1001_v51  ;;  %v1011_v56 = vand.u32 2147483647, %v1001_v51  ;;  %vm1007_vm10 = vweird.f32 %v1001_v51 }
 0x3f3   : > { %v1014_v58 = vor.u32 1.1754944e-38, %v1013_v54  ;;  %vm1012_vm12 = vcmp.eq.f32.partialorder %v1011_v56, 8.507059e+37  ;;  %v1098_v54 = vld [vmem:[%s1996_s9] sm:$0xff] }
 0x3f7   : > { %v1422_v45 = vpop.eup %1421 }
 0x3f8   : > { %v1003_v52 = vmul.f32 %v1422_v45, %v1001_v51  ;;  %vm1008_vm9 = vweird.f32 %v1422_v45 }
 0x3f9   : > { %vm1009_vm11 = vmor %vm1007_vm10, %vm1008_vm9  ;;  %vm900_vm9 = vcmask 392448   ;;  %vm996_vm10 = vcmask 523648  }
 0x3fa   : > { %v1004_v53 = vsub.f32 1.0, %v1003_v52  ;;  %v1100_v52 = vld [vmem:[%s1996_s9 + $0x10] sm:$0xff] }
 0x3fc   : > { %v1005_v55 = vmul.f32 %v1422_v45, %v1004_v53  ;;  %v1099_v53 = vld [vmem:[%s1996_s9 + $0x8] sm:$0xff] }
 0x3fe   : > { %v1006_v57 = vadd.f32 %v1422_v45, %v1005_v55 }
 0x400   : > { %v1010_v59 = vsel %vm1009_vm11, %v1422_v45, %v1006_v57  ;;  %v1101_v45 = vld [vmem:[%s1996_s9 + $0x18] sm:$0xff] }
 0x401   : > { %v1015_v60 = vsel %vm1012_vm12, %v1014_v58, %v1010_v59  ;;  %1126 = vmatpush.msrb.mxu2 %v1101_v45 }
 0x402   : > { %1020 = vperm.xlu0 %1396, %v1015_v60  }
 0x403   : > { %1127 = vmatpush.msrb.mxu2 %v1100_v52 }
 0x405   : > { %1128 = vmatpush.msrb.mxu2 %v1099_v53 }
 0x407   : > { %1129 = vmatpush.msrb.mxu2 %v1098_v54 }
 0x433   : > { %v858_v63 = vpop.xlane.xlu0 %857 }
 0x434   : > { %v859_v0 = vadd.f32 %v858_v63, %v855_v62 }
 0x436   : > { %860 = vst.msk [vmem:[#allocation4 + $0x10] sm:$0xff] %vm548_vm4, %v859_v0 }
 0x43b   : > { %v954_v3 = vpop.xlane.xlu1 %953 }
 0x43c   : > { %v955_v4 = vadd.f32 %v954_v3, %v951_v2 }
 0x43d   : > { %v1049_v5 = vld [vmem:[#allocation4 + $0x10] sm:$0xff] }
 0x43e   : > { %956 = vst.msk [vmem:[#allocation4 + $0x18] sm:$0xff] %vm548_vm4, %v955_v4  ;;  %1423 = vrcp.f32 %v1049_v5  ;;  %v1061_v15 = vand.u32 2147483648, %v1049_v5  ;;  %vm1055_vm14 = vweird.f32 %v1049_v5  ;;  %v1059_v16 = vand.u32 2147483647, %v1049_v5 }
 0x440   : > { %v1062_v21 = vor.u32 1.1754944e-38, %v1061_v15  ;;  %vm1060_vm3 = vcmp.eq.f32.partialorder %v1059_v16, 8.507059e+37 }
 0x442   : > { %v885_v6 = vpop.f32.mrf.mxu3 }
 0x443   : > { %896 = vrot.lane.b32.xlu2 %v885_v6, %s1612_s19  ;;  %s1312_s19 = sshll.u32 %s2028_s11, 3 }
 0x444   : > { %v1424_v7 = vpop.eup %1423  ;;  %v981_v12 = vpop.f32.mrf.mxu1  ;;  %s1147_s27 = scalar_lea.hbm %s2029_s16, %s1312_s19 }
 0x445   : > { %v1051_v8 = vmul.f32 %v1424_v7, %v1049_v5  ;;  %v1073_v9 = vld [vmem:[#allocation4 + $0x18] sm:$0xff]  ;;  %vm1056_vm13 = vweird.f32 %v1424_v7  ;;  %s1151_s29 = sshll.u32 %s1147_s27, 4  ;;  %s1152_s29 = int_to_ptr.hbm [resolvable:$true] %s1151_s29 }
 0x446   : > { %1425 = vrcp.f32 %v1073_v9  ;;  %vm1057_vm15 = vmor %vm1055_vm14, %vm1056_vm13  ;;  %v1085_v22 = vand.u32 2147483648, %v1073_v9  ;;  %v1083_v25 = vand.u32 2147483647, %v1073_v9  ;;  %vm1079_vm6 = vweird.f32 %v1073_v9  ;;  %v892_v35 = vpop.permute.xlu0 %891  ;;  %s1531_s13 = sshra.s32 %s1152_s29, 4  ;;  %s1532_s13 = int_to_ptr.hbm [resolvable:$true] %s1531_s13 }
 0x447   : > { %v1052_v10 = vsub.f32 1.0, %v1051_v8  ;;  %s1533_s10 = scalar_lea.hbm %s1532_s13, 8  ;;  %p1538_p7 = scmp.lt.s32.totalorder %s1532_s13, %s2029_s16 }
 0x448   : > { %v1086_v31 = vor.u32 1.1754944e-38, %v1085_v22  ;;  %vm1084_vm8 = vcmp.eq.f32.partialorder %v1083_v25, 8.507059e+37  ;;  %p1534_p4 = scmp.ne.s32.totalorder %s1532_s13, %s1533_s10  ;;  %p1539_p8 = scmp.lt.s32.totalorder %s1537_s1, %s1533_s10 }
 0x449   : > { %v1053_v11 = vmul.f32 %v1424_v7, %v1052_v10 }
 0x44a   : > { %p1535_p5 = pnand %p1534_p4, %p1729_p9  ;;  %p1540_p10 = por %p1539_p8, %p1538_p7 }
 0x44b   : > { %992 = vrot.lane.b32.xlu2 %v981_v12, %s1613_s22  ;;  %v1054_v13 = vadd.f32 %v1424_v7, %v1053_v11 }
 0x44c   : > { %v1426_v14 = vpop.eup %1425  ;;  %p1536_p6 = pneg %p1535_p5 }
 0x44d   : > { %v1075_v17 = vmul.f32 %v1426_v14, %v1073_v9  ;;  %v1058_v19 = vsel %vm1057_vm15, %v1424_v7, %v1054_v13  ;;  %vm1080_vm4 = vweird.f32 %v1426_v14 }
 0x44e   : > { %v1063_v27 = vsel %vm1060_vm3, %v1062_v21, %v1058_v19  ;;  %vm1081_vm7 = vmor %vm1079_vm6, %vm1080_vm4  ;;  %p1541_p13 = pnand %p1540_p10, %p1536_p6 }
 0x44f   : > { %v1076_v20 = vsub.f32 1.0, %v1075_v17 }
 0x451   : > { %v1077_v24 = vmul.f32 %v1426_v14, %v1076_v20 }
 0x453   : > { %v801_v28 = vpop.permute.xlu1 %800  ;;  %1068 = vperm.xlu2 %1397, %v1063_v27   ;;  %v1078_v29 = vadd.f32 %v1426_v14, %v1077_v24 }
 0x454   : > { %v803_v30 = vadd.f32 %v801_v28, %v798_v26 }
 0x455   : > { %v1082_v32 = vsel %vm1081_vm7, %v1426_v14, %v1078_v29 }
 0x456   : > { %805 = vst.msk [vmem:[#allocation5] sm:$0xff] %vm804_vm5, %v803_v30  ;;  %v1087_v33 = vsel %vm1084_vm8, %v1086_v31, %v1082_v32 }
 0x457   : > { %1092 = vperm.xlu0 %1396, %v1087_v33  }
 0x45b   : > { %v988_v39 = vpop.permute.xlu1 %987 }
 0x45d   : > { %v888_v34 = vld [vmem:[#allocation5] sm:$0xff] }
 0x45e   : > { %v894_v36 = vmul.f32 %v892_v35, %v888_v34 }
 0x463   : > { %v1045_v55 = vpop.permute.xlu1 %1044 }
 0x474   : > { %v1021_v49 = vpop.permute.xlu0 %1020 }
 0x49d   : > { %v897_v37 = vpop.permute.xlu2 %896 }
 0x49e   : > { %v899_v38 = vadd.f32 %v897_v37, %v894_v36 }
 0x4a0   : > { %901 = vst.msk [vmem:[#allocation5] sm:$0xff] %vm900_vm9, %v899_v38 }
 0x4a5   : > { %v993_v42 = vpop.permute.xlu2 %992 }
 0x4a7   : > { %v984_v40 = vld [vmem:[#allocation5] sm:$0xff] }
 0x4a8   : > { %v990_v41 = vmul.f32 %v988_v39, %v984_v40 }
 0x4aa   : > { %v995_v43 = vadd.f32 %v993_v42, %v990_v41 }
 0x4ac   : > { %997 = vst.msk [vmem:[#allocation5] sm:$0xff] %vm996_vm10, %v995_v43 }
 0x4ad   : > { %v1069_v58 = vpop.permute.xlu2 %1068 }
 0x4b3   : > { %v1017_v50 = vld [vmem:[#allocation5] sm:$0xff] }
 0x4b4   : > { %v1023_v51 = vmul.f32 %v1021_v49, %v1017_v50 }
 0x4b6   : > { %1024 = vst.msk [vmem:[#allocation5] sm:$0xff] %vm624_vm2, %v1023_v51 }
 0x4bd   : > { %v1041_v56 = vld [vmem:[#allocation5] sm:$0xff] }
 0x4be   : > { %v1047_v57 = vmul.f32 %v1045_v55, %v1041_v56 }
 0x4c0   : > { %1048 = vst.msk [vmem:[#allocation5] sm:$0xff] %vm804_vm5, %v1047_v57 }
 0x4c7   : > { %v1065_v59 = vld [vmem:[#allocation5] sm:$0xff] }
 0x4c8   : > { %v1071_v60 = vmul.f32 %v1069_v58, %v1065_v59 }
 0x4c9   : > { %v1093_v62 = vpop.permute.xlu0 %1092 }
 0x4ca   : > { %1072 = vst.msk [vmem:[#allocation5] sm:$0xff] %vm900_vm9, %v1071_v60 }
 0x4d1   : > { %v1089_v61 = vld [vmem:[#allocation5] sm:$0xff] }
 0x4d2   : > { %v1095_v63 = vmul.f32 %v1093_v62, %v1089_v61 }
 0x4d4   : > { %1096 = vst.msk [vmem:[#allocation5] sm:$0xff] %vm996_vm10, %v1095_v63 }
 0x4db   : > { %v1097_v0 = vld [vmem:[#allocation5] sm:$0xff] }
 0x4dc   : > { %1310 = vmatmul.msk.f32.vlgmr.msrb.gmra.mxu2 %vm546_vm1, %v1097_v0 }
 0x55f   : > { %v1131_v2 = vpop.f32.mrf.mxu2 }
 0x560   : > { %v1132_v3 = vadd.f32 %v1402_v1, %v1131_v2 }
 0x562   : > { %1134 = vst.msk [vmem:[%s508_s20] sm:$0xff] %vm522_vm0, %v1132_v3 }
 0x563   : > { %1544 = shalt.err (!%p1541_p13)
}
 0x564   : > { %1321 = dma.vmem_to_hbm [thread:$0]  (%p1729_p9), %s1150_s12, 128, %s1152_s29, %s1136_s26  }
 0x565 PF: > { %s2032_s21 = sld [smem:[#allocation16_spill]]  ;;  %p1334_p0 = pnand %p1283_p12, %p1736_p11 }
 0x566   : > { %s2034_s22 = sld [smem:[#allocation20_spill]] }
 0x567   : > { %p1335_p1 = pneg %p1334_p0 }
 0x56b   : > { %s1163_s15 = sand.u32 1, %s2032_s21  }
 0x56c   : > { %s1164_s27 = scalar_lea.sflag [#allocation8], %s1163_s15 }
 0x56d   : > { %1578 = dma.done.wait (%p1335_p1), %s1164_s27, 128  }
 0x56e   : > { %1580 = vsyncadd (%p1335_p1), %s1164_s27, 4294967168  ;;  %s30_s22 = sadd.s32 1, %s2034_s22   ;;  %s2035_s25 = sld [smem:[#allocation17_spill]] }
 0x56f   : > { %p27_p2 = scmp.ge.s32.totalorder %s30_s22, 4   ;;  %s2036_s19 = sld [smem:[#allocation23_spill]] }
 0x570   : > { %s2037_s20 = sld [smem:[#allocation19_spill]]  ;;  %s2039_s17 = smov %s1587_s18 }
 0x571   : > { %s2038_s21 = sld [smem:[#allocation21_spill]]  ;;  %29 = sbr.rel (!%p27_p2) target bundleno = 12 (0xc), region = 147 }
 0x574   : > { %s2040_s18 = smov %s2035_s25 }
 0x576   :  { %1170 = vsyncpa [#allocation7], 1 }
 0x577   :  { %1172 = vsyncpa [#allocation7 + $0x1], 1 }
 0x578   :  { %1173 = vsyncpa [#allocation10], 1 }
 0x579   :  { %1175 = vsyncpa [#allocation10 + $0x1], 1 }
 0x57a   :  { %1176 = vsyncpa [#allocation8], 1 }
 0x57b   :  { %1178 = vsyncpa [#allocation8 + $0x1], 1 }

</bundles_post_ra>
